<compile_context>
chip_gen: v6e
topology: v6e:2x2x1
jax: 0.10.0
libtpu: 0.0.40
codegen_flags: <defaults>
</compile_context>

<pallas_src>
import functools

import jax
import jax.numpy as jnp
from jax.experimental import pallas as pl
from jax.experimental.pallas import tpu as pltpu


# ---------------------------------------------------------------------------
# Tiling helpers
# ---------------------------------------------------------------------------

def _pick_tile(dim, candidates):
    """Largest candidate tile that evenly divides `dim`, else the whole dim."""
    for c in candidates:
        if dim % c == 0 and dim >= c:
            return c
    return dim


def _round_up(x, m):
    return ((x + m - 1) // m) * m


# ---------------------------------------------------------------------------
# Linear (tiled matmul + bias + optional activation)
# ---------------------------------------------------------------------------

def _linear_kernel(x_ref, w_ref, b_ref, o_ref, acc_ref, *, activation):
    @pl.when(pl.program_id(2) == 0)
    def _():
        acc_ref[...] = jnp.zeros_like(acc_ref)

    acc_ref[...] += jnp.dot(x_ref[...], w_ref[...],
                            preferred_element_type=jnp.float32)

    @pl.when(pl.program_id(2) == pl.num_programs(2) - 1)
    def _():
        y = acc_ref[...] + b_ref[...].astype(jnp.float32)
        if activation == "gelu":
            y = jax.nn.gelu(y, approximate=True)
        elif activation == "tanh":
            y = jnp.tanh(y)
        o_ref[...] = y.astype(o_ref.dtype)


def linear(x, w, b, activation=None, out_dtype=None):
    """Tiled matmul+bias(+activation). x:(M,K) w:(K,N) b:(N,). K is grid-tiled with an
    f32 accumulator, so per-step VMEM is independent of K."""
    M, K = x.shape
    _, N = w.shape
    out_dtype = out_dtype or x.dtype

    # Token-axis tile: larger is better (weight re-fetched M/tm times -> HBM-bound).
    tm = _pick_tile(M, (2048, 1024, 512, 256, 128))
    M_pad = M
    if tm == M and M > 256:
        # Big but non-divisible M: pad to keep the tiled fast path instead of one giant block.
        M_pad = _round_up(M, 256)
        x = jnp.pad(x, ((0, M_pad - M), (0, 0)))
        tm = _pick_tile(M_pad, (2048, 1024, 512, 256))
    tn = _pick_tile(N, (512, 256, 128))
    tk = _pick_tile(K, (1024, 512, 256))

    # Explicit scoped-VMEM budget sized from the chosen tiles (double-buffered inputs/outputs
    # + f32 accumulator), capped to leave headroom inside v7x's 64 MiB physical VMEM.
    in_bytes = x.dtype.itemsize
    out_bytes = jnp.dtype(out_dtype).itemsize
    vmem_need = (2 * (tm * tk + tk * tn + tn) * in_bytes
                 + 2 * tm * tn * out_bytes
                 + tm * tn * 4)
    vmem_limit = int(min(max(2 * vmem_need, 32 * 1024 * 1024), 48 * 1024 * 1024))

    out = pl.pallas_call(
        functools.partial(_linear_kernel, activation=activation),
        out_shape=jax.ShapeDtypeStruct((M_pad, N), out_dtype),
        grid=(M_pad // tm, N // tn, K // tk),
        in_specs=[
            pl.BlockSpec((tm, tk), lambda i, j, k: (i, k)),
            pl.BlockSpec((tk, tn), lambda i, j, k: (k, j)),
            pl.BlockSpec((1, tn), lambda i, j, k: (0, j)),
        ],
        out_specs=pl.BlockSpec((tm, tn), lambda i, j, k: (i, j)),
        scratch_shapes=[pltpu.VMEM((tm, tn), jnp.float32)],
        compiler_params=pltpu.CompilerParams(
            dimension_semantics=("parallel", "parallel", "arbitrary"),
            vmem_limit_bytes=vmem_limit),
    )(x, w, b.reshape(1, N))
    return out[:M] if M_pad != M else out


# ---------------------------------------------------------------------------
# LayerNorm (optionally with fused residual add)
# ---------------------------------------------------------------------------

def _ln_math(x, g, b):
    mean = jnp.mean(x, axis=-1, keepdims=True)
    c = x - mean
    var = jnp.mean(c * c, axis=-1, keepdims=True)
    inv = jax.lax.rsqrt(var + 1e-12)
    return c * inv * g + b


def _layernorm_kernel(x_ref, g_ref, b_ref, o_ref):
    x = x_ref[...].astype(jnp.float32)
    o_ref[...] = _ln_math(x, g_ref[...], b_ref[...]).astype(o_ref.dtype)


def _add_layernorm_kernel(x_ref, r_ref, g_ref, b_ref, o_ref):
    x = x_ref[...].astype(jnp.float32) + r_ref[...].astype(jnp.float32)
    o_ref[...] = _ln_math(x, g_ref[...], b_ref[...]).astype(o_ref.dtype)


def layernorm(x, g, b, residual=None, out_dtype=None):
    """Row-tiled LayerNorm over (M, H); optionally fuses `x + residual` first."""
    M, H = x.shape
    out_dtype = out_dtype or x.dtype

    tm = _pick_tile(M, (1024, 512, 256, 128))
    M_pad = M
    if tm == M and M > 256:
        M_pad = _round_up(M, 256)
        pad = ((0, M_pad - M), (0, 0))
        x = jnp.pad(x, pad)
        if residual is not None:
            residual = jnp.pad(residual, pad)
        tm = _pick_tile(M_pad, (1024, 512, 256))

    row_spec = pl.BlockSpec((tm, H), lambda i: (i, 0))
    vec_spec = pl.BlockSpec((1, H), lambda i: (0, 0))
    if residual is None:
        kernel, inputs, in_specs = _layernorm_kernel, (x,), [row_spec]
    else:
        kernel, inputs, in_specs = _add_layernorm_kernel, (x, residual), [row_spec, row_spec]

    out = pl.pallas_call(
        kernel,
        out_shape=jax.ShapeDtypeStruct((M_pad, H), out_dtype),
        grid=(M_pad // tm,),
        in_specs=in_specs + [vec_spec, vec_spec],
        out_specs=row_spec,
        compiler_params=pltpu.CompilerParams(dimension_semantics=("parallel",)),
    )(*inputs, g.reshape(1, H), b.reshape(1, H))
    return out[:M] if M_pad != M else out


# ---------------------------------------------------------------------------
# Attention (head-group + q-tile grid, fused qkv input)
# ---------------------------------------------------------------------------

def _attn_group_kernel(q_ref, k_ref, v_ref, m_ref, o_ref, *, heads, scale):
    # q: (tq, slab), k/v: (S, slab), m: (1, S), o: (tq, slab); slab = heads * Dh (mult of 128).
    q = q_ref[...] * scale              # fold scale into q once (tq*slab elems, not per-head S*S)
    k = k_ref[...]
    v = v_ref[...]
    m = m_ref[...].astype(jnp.float32)  # additive mask, 0 / -1e9
    slab = q.shape[-1]
    dh = slab // heads
    for h in range(heads):              # 1-2 heads per 128-lane slab; static slices
        sl = slice(h * dh, (h + 1) * dh)
        s = jax.lax.dot_general(q[:, sl], k[:, sl], (((1,), (1,)), ((), ())),
                                preferred_element_type=jnp.float32)
        s = s + m
        s = s - jnp.max(s, axis=-1, keepdims=True)
        p = jnp.exp(s)
        inv = pl.reciprocal(jnp.sum(p, axis=-1, keepdims=True), approx=True)
        acc = jnp.dot(p.astype(v.dtype), v[:, sl], preferred_element_type=jnp.float32)
        o_ref[:, sl] = (acc * inv).astype(o_ref.dtype)   # store directly; no f32 concat list


def _attn_full_kernel(qkv_ref, m_ref, o_ref, *, num_heads, hidden, scale):
    # Fallback (tiny shapes / head slabs not a multiple of 128): whole (S, 3H) block per batch.
    qkv = qkv_ref[...]
    m = m_ref[...].astype(jnp.float32)
    H = hidden
    dh = H // num_heads
    for h in range(num_heads):
        qh = qkv[:, h * dh:(h + 1) * dh] * scale
        kh = qkv[:, H + h * dh:H + (h + 1) * dh]
        vh = qkv[:, 2 * H + h * dh:2 * H + (h + 1) * dh]
        s = jax.lax.dot_general(qh, kh, (((1,), (1,)), ((), ())),
                                preferred_element_type=jnp.float32)
        s = s + m
        s = s - jnp.max(s, axis=-1, keepdims=True)
        p = jnp.exp(s)
        inv = pl.reciprocal(jnp.sum(p, axis=-1, keepdims=True), approx=True)
        acc = jnp.dot(p.astype(vh.dtype), vh, preferred_element_type=jnp.float32)
        o_ref[:, h * dh:(h + 1) * dh] = (acc * inv).astype(o_ref.dtype)


def attention(qkv, mask, num_heads):
    """qkv: (B, S, 3H) head-merged (q|k|v along the lane axis); mask: (B, 1, S) additive."""
    B, S, three_h = qkv.shape
    H = three_h // 3
    dh = H // num_heads
    scale = 1.0 / (dh ** 0.5)

    # Smallest head group whose lane slab is a multiple of 128 (e.g. 2 heads of 64 for BERT).
    hpb = 0
    for cand in range(1, num_heads + 1):
        if num_heads % cand == 0 and (cand * dh) % 128 == 0:
            hpb = cand
            break

    if hpb:
        num_groups = num_heads // hpb
        slab = hpb * dh
        tq = _pick_tile(S, (256, 128))
        q_spec = pl.BlockSpec((None, tq, slab), lambda b, g, qi: (b, qi, g))
        # k/v index maps don't depend on qi (innermost axis) -> blocks stay resident per (b, g).
        k_spec = pl.BlockSpec((None, S, slab),
                              lambda b, g, qi: (b, 0, num_groups + g))
        v_spec = pl.BlockSpec((None, S, slab),
                              lambda b, g, qi: (b, 0, 2 * num_groups + g))
        m_spec = pl.BlockSpec((None, 1, S), lambda b, g, qi: (b, 0, 0))
        o_spec = pl.BlockSpec((None, tq, slab), lambda b, g, qi: (b, qi, g))
        return pl.pallas_call(
            functools.partial(_attn_group_kernel, heads=hpb, scale=scale),
            out_shape=jax.ShapeDtypeStruct((B, S, H), qkv.dtype),
            grid=(B, num_groups, S // tq),
            in_specs=[q_spec, k_spec, v_spec, m_spec],
            out_specs=o_spec,
            compiler_params=pltpu.CompilerParams(
                dimension_semantics=("parallel", "parallel", "parallel")),
        )(qkv, qkv, qkv, mask)

    # Fallback path (small/odd head dims): one whole-sequence block per batch.
    return pl.pallas_call(
        functools.partial(_attn_full_kernel, num_heads=num_heads, hidden=H, scale=scale),
        out_shape=jax.ShapeDtypeStruct((B, S, H), qkv.dtype),
        grid=(B,),
        in_specs=[pl.BlockSpec((None, S, three_h), lambda b: (b, 0, 0)),
                  pl.BlockSpec((None, 1, S), lambda b: (b, 0, 0))],
        out_specs=pl.BlockSpec((None, S, H), lambda b: (b, 0, 0)),
        compiler_params=pltpu.CompilerParams(dimension_semantics=("parallel",)),
    )(qkv, mask)


# ---------------------------------------------------------------------------
# Model (parameters + forward)
# ---------------------------------------------------------------------------

def init_params(key, *, vocab_size, max_pos, type_vocab, hidden, num_layers,
                intermediate, num_labels):
    keys = iter(jax.random.split(key, 8 + 8 * num_layers))

    def w(shape, dtype=jnp.bfloat16):
        return (jax.random.normal(next(keys), shape, jnp.float32) * 0.02).astype(dtype)

    params = {
        "word_emb": w((vocab_size, hidden)),
        "pos_emb": w((max_pos, hidden)),
        "type_emb": w((type_vocab, hidden)),
        "emb_ln_g": jnp.ones((hidden,), jnp.float32),
        "emb_ln_b": jnp.zeros((hidden,), jnp.float32),
        "layers": [],
        # Pooler / classifier are tiny -> keep f32 and run in plain JAX.
        "pooler_w": w((hidden, hidden), jnp.float32),
        "pooler_b": jnp.zeros((hidden,), jnp.float32),
        "cls_w": w((hidden, num_labels), jnp.float32),
        "cls_b": jnp.zeros((num_labels,), jnp.float32),
    }
    for _ in range(num_layers):
        params["layers"].append({
            # Fused Q|K|V projection.
            "qkv_w": w((hidden, 3 * hidden)),
            "qkv_b": jnp.zeros((3 * hidden,), jnp.float32),
            "o_w": w((hidden, hidden)), "o_b": jnp.zeros((hidden,), jnp.float32),
            "ln1_g": jnp.ones((hidden,), jnp.float32), "ln1_b": jnp.zeros((hidden,), jnp.float32),
            "i_w": w((hidden, intermediate)), "i_b": jnp.zeros((intermediate,), jnp.float32),
            "f_w": w((intermediate, hidden)), "f_b": jnp.zeros((hidden,), jnp.float32),
            "ln2_g": jnp.ones((hidden,), jnp.float32), "ln2_b": jnp.zeros((hidden,), jnp.float32),
        })
    return params


def encoder_layer(x, ext_mask, p, num_heads):
    B, S, H = x.shape
    xf = x.reshape(B * S, H)

    # Fused QKV projection -> attention consumes (B, S, 3H) directly (no jnp.split copies).
    qkv = linear(xf, p["qkv_w"], p["qkv_b"]).reshape(B, S, 3 * H)
    ctx = attention(qkv, ext_mask, num_heads)                       # (B, S, H), head-merged
    attn_out = linear(ctx.reshape(B * S, H), p["o_w"], p["o_b"])
    x1 = layernorm(attn_out, p["ln1_g"], p["ln1_b"], residual=xf)   # fused residual + LN

    ff = linear(x1, p["i_w"], p["i_b"], activation="gelu")
    ff_out = linear(ff, p["f_w"], p["f_b"])
    x2 = layernorm(ff_out, p["ln2_g"], p["ln2_b"], residual=x1)     # fused residual + LN
    return x2.reshape(B, S, H)


def bert_forward(params, input_ids, attention_mask, token_type_ids, num_heads):
    B, S = input_ids.shape
    H = params["word_emb"].shape[1]

    # Embeddings (gather in JAX glue) + LayerNorm (Pallas).
    pos_ids = jnp.arange(S)
    emb = (params["word_emb"][input_ids]
           + params["pos_emb"][pos_ids][None, :, :]
           + params["type_emb"][token_type_ids])
    x = layernorm(emb.reshape(B * S, H),
                  params["emb_ln_g"], params["emb_ln_b"]).reshape(B, S, H)

    # Additive attention mask: 0 where attended, -1e9 where padded.
    ext_mask = ((1.0 - attention_mask.astype(jnp.float32)) * -1e9).reshape(B, 1, S)

    for layer in params["layers"]:
        x = encoder_layer(x, ext_mask, layer, num_heads)

    # transformer(...)[1] == pooled output: tanh(Linear(CLS token)).  Tiny matmuls -> plain JAX.
    cls_tok = x[:, 0, :].astype(jnp.float32)
    pooled = jnp.tanh(cls_tok @ params["pooler_w"] + params["pooler_b"])

    # classifier = Dropout (identity at inference) + Linear.
    logits = pooled @ params["cls_w"] + params["cls_b"]
    return logits


# ---------------------------------------------------------------------------
# Driver
# ---------------------------------------------------------------------------

if __name__ == "__main__":
    B, S, H = 2, 8, 32
    num_heads, num_layers, intermediate = 2, 2, 64
    vocab_size, max_pos, type_vocab, num_labels = 100, 16, 2, 3

    key = jax.random.PRNGKey(0)
    pkey, ikey = jax.random.split(key)

    params = init_params(pkey, vocab_size=vocab_size, max_pos=max_pos,
                         type_vocab=type_vocab, hidden=H, num_layers=num_layers,
                         intermediate=intermediate, num_labels=num_labels)

    input_ids = jax.random.randint(ikey, (B, S), 0, vocab_size, dtype=jnp.int32)
    attention_mask = jnp.array([[1, 1, 1, 1, 1, 1, 1, 1],
                                [1, 1, 1, 1, 1, 1, 0, 0]], dtype=jnp.int32)
    token_type_ids = jnp.concatenate(
        [jnp.zeros((B, S // 2), jnp.int32), jnp.ones((B, S // 2), jnp.int32)], axis=1)

    fwd = jax.jit(functools.partial(bert_forward, num_heads=num_heads))
    logits = fwd(params, input_ids, attention_mask, token_type_ids)
    jax.block_until_ready(logits)

    assert logits.shape == (B, num_labels)
    assert jnp.all(jnp.isfinite(logits))
    print("KERNEL_OK")
</pallas_src>

<mosaic_0001>
module attributes {stable_mosaic.version = 11 : i64} {
  func.func @_layernorm_kernel(%arg0: i32, %arg1: memref<16x32xbf16, #tpu.memory_space<vmem>>, %arg2: memref<1x32xf32, #tpu.memory_space<vmem>>, %arg3: memref<1x32xf32, #tpu.memory_space<vmem>>, %arg4: memref<16x32xbf16, #tpu.memory_space<vmem>>) attributes {dimension_semantics = [#tpu.dimension_semantics<parallel>], iteration_bounds = array<i64: 1>, scalar_prefetch = 0 : i64, scratch_operands = 0 : i64, tpu.core_type = #tpu.core_type<tc>, window_params = [{transform_indices = @transform_0, window_bounds = array<i64: 16, 32>}, {pipeline_mode = #tpu.pipeline_mode<synchronous>, transform_indices = @transform_1, window_bounds = array<i64: 1, 32>}, {pipeline_mode = #tpu.pipeline_mode<synchronous>, transform_indices = @transform_2, window_bounds = array<i64: 1, 32>}, {transform_indices = @transform_3, window_bounds = array<i64: 16, 32>}]} {
    %c0 = arith.constant 0 : index
    %c0_0 = arith.constant 0 : index
    %0 = vector.load %arg1[%c0, %c0_0] : memref<16x32xbf16, #tpu.memory_space<vmem>>, vector<16x32xbf16>
    %1 = arith.extf %0 : vector<16x32xbf16> to vector<16x32xf32>
    %c0_1 = arith.constant 0 : index
    %c0_2 = arith.constant 0 : index
    %2 = vector.load %arg2[%c0_1, %c0_2] : memref<1x32xf32, #tpu.memory_space<vmem>>, vector<1x32xf32>
    %c0_3 = arith.constant 0 : index
    %c0_4 = arith.constant 0 : index
    %3 = vector.load %arg3[%c0_3, %c0_4] : memref<1x32xf32, #tpu.memory_space<vmem>>, vector<1x32xf32>
    %cst = arith.constant dense<0.000000e+00> : vector<16xf32>
    %4 = vector.multi_reduction <add>, %1, %cst [1] : vector<16x32xf32> to vector<16xf32>
    %5 = vector.shape_cast %4 : vector<16xf32> to vector<16x1xf32>
    %cst_5 = arith.constant 3.200000e+01 : f32
    %6 = vector.broadcast %cst_5 : f32 to vector<16x1xf32>
    %7 = arith.divf %5, %6 : vector<16x1xf32>
    %8 = vector.broadcast %7 : vector<16x1xf32> to vector<16x32xf32>
    %9 = arith.subf %1, %8 : vector<16x32xf32>
    %10 = arith.mulf %9, %9 : vector<16x32xf32>
    %cst_6 = arith.constant dense<0.000000e+00> : vector<16xf32>
    %11 = vector.multi_reduction <add>, %10, %cst_6 [1] : vector<16x32xf32> to vector<16xf32>
    %12 = vector.shape_cast %11 : vector<16xf32> to vector<16x1xf32>
    %cst_7 = arith.constant 3.200000e+01 : f32
    %13 = vector.broadcast %cst_7 : f32 to vector<16x1xf32>
    %14 = arith.divf %12, %13 : vector<16x1xf32>
    %cst_8 = arith.constant 9.99999996E-13 : f32
    %15 = vector.broadcast %cst_8 : f32 to vector<16x1xf32>
    %16 = arith.addf %14, %15 : vector<16x1xf32>
    %17 = math.rsqrt %16 : vector<16x1xf32>
    %18 = vector.broadcast %17 : vector<16x1xf32> to vector<16x32xf32>
    %19 = arith.mulf %9, %18 : vector<16x32xf32>
    %20 = vector.broadcast %2 : vector<1x32xf32> to vector<16x32xf32>
    %21 = arith.mulf %19, %20 : vector<16x32xf32>
    %22 = vector.broadcast %3 : vector<1x32xf32> to vector<16x32xf32>
    %23 = arith.addf %21, %22 : vector<16x32xf32>
    %24 = arith.truncf %23 : vector<16x32xf32> to vector<16x32xbf16>
    %c0_9 = arith.constant 0 : index
    %c0_10 = arith.constant 0 : index
    %25 = vector.load %arg4[%c0_9, %c0_10] : memref<16x32xbf16, #tpu.memory_space<vmem>>, vector<16x32xbf16>
    tpu.vector_store %arg4[%c0_9, %c0_10], %24 {strides = array<i32>} : memref<16x32xbf16, #tpu.memory_space<vmem>>, vector<16x32xbf16>,
    return
  }
  func.func @transform_0(%arg0: i32) -> (i32, i32) {
    %c0_i32 = arith.constant 0 : i32
    %c0_i32_0 = arith.constant 0 : i32
    return %arg0, %c0_i32 : i32, i32
  }
  func.func @transform_1(%arg0: i32) -> (i32, i32) {
    %c0_i32 = arith.constant 0 : i32
    %c0_i32_0 = arith.constant 0 : i32
    %c0_i32_1 = arith.constant 0 : i32
    return %c0_i32, %c0_i32_0 : i32, i32
  }
  func.func @transform_2(%arg0: i32) -> (i32, i32) {
    %c0_i32 = arith.constant 0 : i32
    %c0_i32_0 = arith.constant 0 : i32
    %c0_i32_1 = arith.constant 0 : i32
    return %c0_i32, %c0_i32_0 : i32, i32
  }
  func.func @transform_3(%arg0: i32) -> (i32, i32) {
    %c0_i32 = arith.constant 0 : i32
    %c0_i32_0 = arith.constant 0 : i32
    return %arg0, %c0_i32 : i32, i32
  }
}

module attributes {stable_mosaic.version = 11 : i64} {
  func.func @_linear_kernel(%arg0: i32, %arg1: i32, %arg2: i32, %arg3: memref<16x32xbf16, #tpu.memory_space<vmem>>, %arg4: memref<32x96xbf16, #tpu.memory_space<vmem>>, %arg5: memref<1x96xf32, #tpu.memory_space<vmem>>, %arg6: memref<16x96xbf16, #tpu.memory_space<vmem>>, %arg7: memref<16x96xf32, #tpu.memory_space<vmem>>) attributes {dimension_semantics = [#tpu.dimension_semantics<parallel>, #tpu.dimension_semantics<parallel>, #tpu.dimension_semantics<arbitrary>], iteration_bounds = array<i64: 1, 1, 1>, scalar_prefetch = 0 : i64, scratch_operands = 1 : i64, tpu.core_type = #tpu.core_type<tc>, window_params = [{transform_indices = @transform_0, window_bounds = array<i64: 16, 32>}, {transform_indices = @transform_1, window_bounds = array<i64: 32, 96>}, {transform_indices = @transform_2, window_bounds = array<i64: 1, 96>}, {transform_indices = @transform_3, window_bounds = array<i64: 16, 96>}]} {
    %c0_i32 = arith.constant 0 : i32
    %0 = arith.cmpi eq, %arg2, %c0_i32 : i32
    %1 = arith.extui %0 : i1 to i32
    %c0_i32_0 = arith.constant 0 : i32
    %2 = arith.cmpi ne, %1, %c0_i32_0 : i32
    scf.if %2 {
      %cst_10 = arith.constant 0.000000e+00 : f32
      %12 = vector.broadcast %cst_10 : f32 to vector<16x96xf32>
      %c0_11 = arith.constant 0 : index
      %c0_12 = arith.constant 0 : index
      %13 = vector.load %arg7[%c0_11, %c0_12] : memref<16x96xf32, #tpu.memory_space<vmem>>, vector<16x96xf32>
      tpu.vector_store %arg7[%c0_11, %c0_12], %12 {strides = array<i32>} : memref<16x96xf32, #tpu.memory_space<vmem>>, vector<16x96xf32>,
    } else {
    }
    %c0 = arith.constant 0 : index
    %c0_1 = arith.constant 0 : index
    %3 = vector.load %arg7[%c0, %c0_1] : memref<16x96xf32, #tpu.memory_space<vmem>>, vector<16x96xf32>
    %c0_2 = arith.constant 0 : index
    %c0_3 = arith.constant 0 : index
    %4 = vector.load %arg3[%c0_2, %c0_3] : memref<16x32xbf16, #tpu.memory_space<vmem>>, vector<16x32xbf16>
    %c0_4 = arith.constant 0 : index
    %c0_5 = arith.constant 0 : index
    %5 = vector.load %arg4[%c0_4, %c0_5] : memref<32x96xbf16, #tpu.memory_space<vmem>>, vector<32x96xbf16>
    %cst = arith.constant dense<0.000000e+00> : vector<16x96xf32>
    %6 = tpu.matmul %4, %5, %cst {dimension_numbers = #tpu.dot_dimension_numbers<[1], [0], [0], [1], [0, 0, 1, 1], [], []>} : vector<16x32xbf16>, vector<32x96xbf16>, vector<16x96xf32> -> vector<16x96xf32>
    %7 = arith.addf %3, %6 : vector<16x96xf32>
    %c0_6 = arith.constant 0 : index
    %c0_7 = arith.constant 0 : index
    %8 = vector.load %arg7[%c0_6, %c0_7] : memref<16x96xf32, #tpu.memory_space<vmem>>, vector<16x96xf32>
    tpu.vector_store %arg7[%c0_6, %c0_7], %7 {strides = array<i32>} : memref<16x96xf32, #tpu.memory_space<vmem>>, vector<16x96xf32>,
    %c0_i32_8 = arith.constant 0 : i32
    %9 = arith.cmpi eq, %arg2, %c0_i32_8 : i32
    %10 = arith.extui %9 : i1 to i32
    %c0_i32_9 = arith.constant 0 : i32
    %11 = arith.cmpi ne, %10, %c0_i32_9 : i32
    scf.if %11 {
      %c0_10 = arith.constant 0 : index
      %c0_11 = arith.constant 0 : index
      %12 = vector.load %arg7[%c0_10, %c0_11] : memref<16x96xf32, #tpu.memory_space<vmem>>, vector<16x96xf32>
      %c0_12 = arith.constant 0 : index
      %c0_13 = arith.constant 0 : index
      %13 = vector.load %arg5[%c0_12, %c0_13] : memref<1x96xf32, #tpu.memory_space<vmem>>, vector<1x96xf32>
      %14 = vector.broadcast %13 : vector<1x96xf32> to vector<16x96xf32>
      %15 = arith.addf %12, %14 : vector<16x96xf32>
      %16 = arith.truncf %15 : vector<16x96xf32> to vector<16x96xbf16>
      %c0_14 = arith.constant 0 : index
      %c0_15 = arith.constant 0 : index
      %17 = vector.load %arg6[%c0_14, %c0_15] : memref<16x96xbf16, #tpu.memory_space<vmem>>, vector<16x96xbf16>
      tpu.vector_store %arg6[%c0_14, %c0_15], %16 {strides = array<i32>} : memref<16x96xbf16, #tpu.memory_space<vmem>>, vector<16x96xbf16>,
    } else {
    }
    return
  }
  func.func @transform_0(%arg0: i32, %arg1: i32, %arg2: i32) -> (i32, i32) {
    %c0_i32 = arith.constant 0 : i32
    return %arg0, %arg2 : i32, i32
  }
  func.func @transform_1(%arg0: i32, %arg1: i32, %arg2: i32) -> (i32, i32) {
    %c0_i32 = arith.constant 0 : i32
    return %arg2, %arg1 : i32, i32
  }
  func.func @transform_2(%arg0: i32, %arg1: i32, %arg2: i32) -> (i32, i32) {
    %c0_i32 = arith.constant 0 : i32
    %c0_i32_0 = arith.constant 0 : i32
    return %c0_i32, %arg1 : i32, i32
  }
  func.func @transform_3(%arg0: i32, %arg1: i32, %arg2: i32) -> (i32, i32) {
    %c0_i32 = arith.constant 0 : i32
    return %arg0, %arg1 : i32, i32
  }
}

module attributes {stable_mosaic.version = 11 : i64} {
  func.func @_linear_kernel(%arg0: i32, %arg1: i32, %arg2: i32, %arg3: memref<16x32xbf16, #tpu.memory_space<vmem>>, %arg4: memref<32x32xbf16, #tpu.memory_space<vmem>>, %arg5: memref<1x32xf32, #tpu.memory_space<vmem>>, %arg6: memref<16x32xbf16, #tpu.memory_space<vmem>>, %arg7: memref<16x32xf32, #tpu.memory_space<vmem>>) attributes {dimension_semantics = [#tpu.dimension_semantics<parallel>, #tpu.dimension_semantics<parallel>, #tpu.dimension_semantics<arbitrary>], iteration_bounds = array<i64: 1, 1, 1>, scalar_prefetch = 0 : i64, scratch_operands = 1 : i64, tpu.core_type = #tpu.core_type<tc>, window_params = [{transform_indices = @transform_0, window_bounds = array<i64: 16, 32>}, {transform_indices = @transform_1, window_bounds = array<i64: 32, 32>}, {transform_indices = @transform_2, window_bounds = array<i64: 1, 32>}, {transform_indices = @transform_3, window_bounds = array<i64: 16, 32>}]} {
    %c0_i32 = arith.constant 0 : i32
    %0 = arith.cmpi eq, %arg2, %c0_i32 : i32
    %1 = arith.extui %0 : i1 to i32
    %c0_i32_0 = arith.constant 0 : i32
    %2 = arith.cmpi ne, %1, %c0_i32_0 : i32
    scf.if %2 {
      %cst_10 = arith.constant 0.000000e+00 : f32
      %12 = vector.broadcast %cst_10 : f32 to vector<16x32xf32>
      %c0_11 = arith.constant 0 : index
      %c0_12 = arith.constant 0 : index
      %13 = vector.load %arg7[%c0_11, %c0_12] : memref<16x32xf32, #tpu.memory_space<vmem>>, vector<16x32xf32>
      tpu.vector_store %arg7[%c0_11, %c0_12], %12 {strides = array<i32>} : memref<16x32xf32, #tpu.memory_space<vmem>>, vector<16x32xf32>,
    } else {
    }
    %c0 = arith.constant 0 : index
    %c0_1 = arith.constant 0 : index
    %3 = vector.load %arg7[%c0, %c0_1] : memref<16x32xf32, #tpu.memory_space<vmem>>, vector<16x32xf32>
    %c0_2 = arith.constant 0 : index
    %c0_3 = arith.constant 0 : index
    %4 = vector.load %arg3[%c0_2, %c0_3] : memref<16x32xbf16, #tpu.memory_space<vmem>>, vector<16x32xbf16>
    %c0_4 = arith.constant 0 : index
    %c0_5 = arith.constant 0 : index
    %5 = vector.load %arg4[%c0_4, %c0_5] : memref<32x32xbf16, #tpu.memory_space<vmem>>, vector<32x32xbf16>
    %cst = arith.constant dense<0.000000e+00> : vector<16x32xf32>
    %6 = tpu.matmul %4, %5, %cst {dimension_numbers = #tpu.dot_dimension_numbers<[1], [0], [0], [1], [0, 0, 1, 1], [], []>} : vector<16x32xbf16>, vector<32x32xbf16>, vector<16x32xf32> -> vector<16x32xf32>
    %7 = arith.addf %3, %6 : vector<16x32xf32>
    %c0_6 = arith.constant 0 : index
    %c0_7 = arith.constant 0 : index
    %8 = vector.load %arg7[%c0_6, %c0_7] : memref<16x32xf32, #tpu.memory_space<vmem>>, vector<16x32xf32>
    tpu.vector_store %arg7[%c0_6, %c0_7], %7 {strides = array<i32>} : memref<16x32xf32, #tpu.memory_space<vmem>>, vector<16x32xf32>,
    %c0_i32_8 = arith.constant 0 : i32
    %9 = arith.cmpi eq, %arg2, %c0_i32_8 : i32
    %10 = arith.extui %9 : i1 to i32
    %c0_i32_9 = arith.constant 0 : i32
    %11 = arith.cmpi ne, %10, %c0_i32_9 : i32
    scf.if %11 {
      %c0_10 = arith.constant 0 : index
      %c0_11 = arith.constant 0 : index
      %12 = vector.load %arg7[%c0_10, %c0_11] : memref<16x32xf32, #tpu.memory_space<vmem>>, vector<16x32xf32>
      %c0_12 = arith.constant 0 : index
      %c0_13 = arith.constant 0 : index
      %13 = vector.load %arg5[%c0_12, %c0_13] : memref<1x32xf32, #tpu.memory_space<vmem>>, vector<1x32xf32>
      %14 = vector.broadcast %13 : vector<1x32xf32> to vector<16x32xf32>
      %15 = arith.addf %12, %14 : vector<16x32xf32>
      %16 = arith.truncf %15 : vector<16x32xf32> to vector<16x32xbf16>
      %c0_14 = arith.constant 0 : index
      %c0_15 = arith.constant 0 : index
      %17 = vector.load %arg6[%c0_14, %c0_15] : memref<16x32xbf16, #tpu.memory_space<vmem>>, vector<16x32xbf16>
      tpu.vector_store %arg6[%c0_14, %c0_15], %16 {strides = array<i32>} : memref<16x32xbf16, #tpu.memory_space<vmem>>, vector<16x32xbf16>,
    } else {
    }
    return
  }
  func.func @transform_0(%arg0: i32, %arg1: i32, %arg2: i32) -> (i32, i32) {
    %c0_i32 = arith.constant 0 : i32
    return %arg0, %arg2 : i32, i32
  }
  func.func @transform_1(%arg0: i32, %arg1: i32, %arg2: i32) -> (i32, i32) {
    %c0_i32 = arith.constant 0 : i32
    return %arg2, %arg1 : i32, i32
  }
  func.func @transform_2(%arg0: i32, %arg1: i32, %arg2: i32) -> (i32, i32) {
    %c0_i32 = arith.constant 0 : i32
    %c0_i32_0 = arith.constant 0 : i32
    return %c0_i32, %arg1 : i32, i32
  }
  func.func @transform_3(%arg0: i32, %arg1: i32, %arg2: i32) -> (i32, i32) {
    %c0_i32 = arith.constant 0 : i32
    return %arg0, %arg1 : i32, i32
  }
}

module attributes {stable_mosaic.version = 11 : i64} {
  func.func @_attn_full_kernel(%arg0: i32, %arg1: memref<1x8x96xbf16, #tpu.memory_space<vmem>>, %arg2: memref<1x1x8xf32, #tpu.memory_space<vmem>>, %arg3: memref<1x8x32xbf16, #tpu.memory_space<vmem>>) attributes {dimension_semantics = [#tpu.dimension_semantics<parallel>], iteration_bounds = array<i64: 2>, scalar_prefetch = 0 : i64, scratch_operands = 0 : i64, tpu.core_type = #tpu.core_type<tc>, window_params = [{transform_indices = @transform_0, window_bounds = array<i64: 1, 8, 96>}, {transform_indices = @transform_1, window_bounds = array<i64: 1, 1, 8>}, {transform_indices = @transform_2, window_bounds = array<i64: 1, 8, 32>}]} {
    %c0 = arith.constant 0 : index
    %c0_0 = arith.constant 0 : index
    %c0_1 = arith.constant 0 : index
    %0 = vector.load %arg1[%c0, %c0_0, %c0_1] : memref<1x8x96xbf16, #tpu.memory_space<vmem>>, vector<1x8x96xbf16>
    %1 = vector.shape_cast %0 : vector<1x8x96xbf16> to vector<8x96xbf16>
    %c0_2 = arith.constant 0 : index
    %c0_3 = arith.constant 0 : index
    %c0_4 = arith.constant 0 : index
    %2 = vector.load %arg2[%c0_2, %c0_3, %c0_4] : memref<1x1x8xf32, #tpu.memory_space<vmem>>, vector<1x1x8xf32>
    %3 = vector.shape_cast %2 : vector<1x1x8xf32> to vector<1x8xf32>
    %4 = vector.extract_strided_slice %1 {offsets = [0, 0], sizes = [8, 16], strides = [1, 1]} : vector<8x96xbf16> to vector<8x16xbf16>
    %cst = arith.constant 2.500000e-01 : bf16
    %5 = vector.broadcast %cst : bf16 to vector<8x16xbf16>
    %6 = arith.mulf %4, %5 : vector<8x16xbf16>
    %7 = vector.extract_strided_slice %1 {offsets = [0, 32], sizes = [8, 16], strides = [1, 1]} : vector<8x96xbf16> to vector<8x16xbf16>
    %8 = vector.extract_strided_slice %1 {offsets = [0, 64], sizes = [8, 16], strides = [1, 1]} : vector<8x96xbf16> to vector<8x16xbf16>
    %cst_5 = arith.constant dense<0.000000e+00> : vector<8x8xf32>
    %9 = tpu.matmul %6, %7, %cst_5 {dimension_numbers = #tpu.dot_dimension_numbers<[1], [1], [0], [0], [0, 0, 1, 0], [], []>} : vector<8x16xbf16>, vector<8x16xbf16>, vector<8x8xf32> -> vector<8x8xf32>
    %10 = vector.broadcast %3 : vector<1x8xf32> to vector<8x8xf32>
    %11 = arith.addf %9, %10 : vector<8x8xf32>
    %cst_6 = arith.constant dense<0xFF800000> : vector<8xf32>
    %12 = vector.multi_reduction <maximumf>, %11, %cst_6 [1] : vector<8x8xf32> to vector<8xf32>
    %13 = vector.shape_cast %12 : vector<8xf32> to vector<8x1xf32>
    %14 = vector.broadcast %13 : vector<8x1xf32> to vector<8x8xf32>
    %15 = arith.subf %11, %14 : vector<8x8xf32>
    %16 = math.exp %15 : vector<8x8xf32>
    %cst_7 = arith.constant dense<0.000000e+00> : vector<8xf32>
    %17 = vector.multi_reduction <add>, %16, %cst_7 [1] : vector<8x8xf32> to vector<8xf32>
    %18 = vector.shape_cast %17 : vector<8xf32> to vector<8x1xf32>
    %19 = tpu.reciprocal %18 {approx = true} : vector<8x1xf32> -> vector<8x1xf32>
    %20 = arith.truncf %16 : vector<8x8xf32> to vector<8x8xbf16>
    %cst_8 = arith.constant dense<0.000000e+00> : vector<8x16xf32>
    %21 = tpu.matmul %20, %8, %cst_8 {dimension_numbers = #tpu.dot_dimension_numbers<[1], [0], [0], [1], [0, 0, 1, 1], [], []>} : vector<8x8xbf16>, vector<8x16xbf16>, vector<8x16xf32> -> vector<8x16xf32>
    %22 = vector.broadcast %19 : vector<8x1xf32> to vector<8x16xf32>
    %23 = arith.mulf %21, %22 : vector<8x16xf32>
    %24 = arith.truncf %23 : vector<8x16xf32> to vector<8x16xbf16>
    %c0_9 = arith.constant 0 : index
    %c0_10 = arith.constant 0 : index
    %c0_11 = arith.constant 0 : index
    %25 = vector.load %arg3[%c0_9, %c0_10, %c0_11] : memref<1x8x32xbf16, #tpu.memory_space<vmem>>, vector<1x8x16xbf16>
    %26 = vector.shape_cast %25 : vector<1x8x16xbf16> to vector<8x16xbf16>
    %27 = vector.shape_cast %24 : vector<8x16xbf16> to vector<1x8x16xbf16>
    tpu.vector_store %arg3[%c0_9, %c0_10, %c0_11], %27 {strides = array<i32>} : memref<1x8x32xbf16, #tpu.memory_space<vmem>>, vector<1x8x16xbf16>,
    %28 = vector.extract_strided_slice %1 {offsets = [0, 16], sizes = [8, 16], strides = [1, 1]} : vector<8x96xbf16> to vector<8x16xbf16>
    %cst_12 = arith.constant 2.500000e-01 : bf16
    %29 = vector.broadcast %cst_12 : bf16 to vector<8x16xbf16>
    %30 = arith.mulf %28, %29 : vector<8x16xbf16>
    %31 = vector.extract_strided_slice %1 {offsets = [0, 48], sizes = [8, 16], strides = [1, 1]} : vector<8x96xbf16> to vector<8x16xbf16>
    %32 = vector.extract_strided_slice %1 {offsets = [0, 80], sizes = [8, 16], strides = [1, 1]} : vector<8x96xbf16> to vector<8x16xbf16>
    %cst_13 = arith.constant dense<0.000000e+00> : vector<8x8xf32>
    %33 = tpu.matmul %30, %31, %cst_13 {dimension_numbers = #tpu.dot_dimension_numbers<[1], [1], [0], [0], [0, 0, 1, 0], [], []>} : vector<8x16xbf16>, vector<8x16xbf16>, vector<8x8xf32> -> vector<8x8xf32>
    %34 = vector.broadcast %3 : vector<1x8xf32> to vector<8x8xf32>
    %35 = arith.addf %33, %34 : vector<8x8xf32>
    %cst_14 = arith.constant dense<0xFF800000> : vector<8xf32>
    %36 = vector.multi_reduction <maximumf>, %35, %cst_14 [1] : vector<8x8xf32> to vector<8xf32>
    %37 = vector.shape_cast %36 : vector<8xf32> to vector<8x1xf32>
    %38 = vector.broadcast %37 : vector<8x1xf32> to vector<8x8xf32>
    %39 = arith.subf %35, %38 : vector<8x8xf32>
    %40 = math.exp %39 : vector<8x8xf32>
    %cst_15 = arith.constant dense<0.000000e+00> : vector<8xf32>
    %41 = vector.multi_reduction <add>, %40, %cst_15 [1] : vector<8x8xf32> to vector<8xf32>
    %42 = vector.shape_cast %41 : vector<8xf32> to vector<8x1xf32>
    %43 = tpu.reciprocal %42 {approx = true} : vector<8x1xf32> -> vector<8x1xf32>
    %44 = arith.truncf %40 : vector<8x8xf32> to vector<8x8xbf16>
    %cst_16 = arith.constant dense<0.000000e+00> : vector<8x16xf32>
    %45 = tpu.matmul %44, %32, %cst_16 {dimension_numbers = #tpu.dot_dimension_numbers<[1], [0], [0], [1], [0, 0, 1, 1], [], []>} : vector<8x8xbf16>, vector<8x16xbf16>, vector<8x16xf32> -> vector<8x16xf32>
    %46 = vector.broadcast %43 : vector<8x1xf32> to vector<8x16xf32>
    %47 = arith.mulf %45, %46 : vector<8x16xf32>
    %48 = arith.truncf %47 : vector<8x16xf32> to vector<8x16xbf16>
    %c0_17 = arith.constant 0 : index
    %c0_18 = arith.constant 0 : index
    %c16 = arith.constant 16 : index
    %49 = vector.load %arg3[%c0_17, %c0_18, %c16] : memref<1x8x32xbf16, #tpu.memory_space<vmem>>, vector<1x8x16xbf16>
    %50 = vector.shape_cast %49 : vector<1x8x16xbf16> to vector<8x16xbf16>
    %51 = vector.shape_cast %48 : vector<8x16xbf16> to vector<1x8x16xbf16>
    tpu.vector_store %arg3[%c0_17, %c0_18, %c16], %51 {strides = array<i32>} : memref<1x8x32xbf16, #tpu.memory_space<vmem>>, vector<1x8x16xbf16>,
    return
  }
  func.func @transform_0(%arg0: i32) -> (i32, i32, i32) {
    %c0_i32 = arith.constant 0 : i32
    %c0_i32_0 = arith.constant 0 : i32
    %c0_i32_1 = arith.constant 0 : i32
    return %arg0, %c0_i32, %c0_i32_0 : i32, i32, i32
  }
  func.func @transform_1(%arg0: i32) -> (i32, i32, i32) {
    %c0_i32 = arith.constant 0 : i32
    %c0_i32_0 = arith.constant 0 : i32
    %c0_i32_1 = arith.constant 0 : i32
    return %arg0, %c0_i32, %c0_i32_0 : i32, i32, i32
  }
  func.func @transform_2(%arg0: i32) -> (i32, i32, i32) {
    %c0_i32 = arith.constant 0 : i32
    %c0_i32_0 = arith.constant 0 : i32
    %c0_i32_1 = arith.constant 0 : i32
    return %arg0, %c0_i32, %c0_i32_0 : i32, i32, i32
  }
}

module attributes {stable_mosaic.version = 11 : i64} {
  func.func @_add_layernorm_kernel(%arg0: i32, %arg1: memref<16x32xbf16, #tpu.memory_space<vmem>>, %arg2: memref<16x32xbf16, #tpu.memory_space<vmem>>, %arg3: memref<1x32xf32, #tpu.memory_space<vmem>>, %arg4: memref<1x32xf32, #tpu.memory_space<vmem>>, %arg5: memref<16x32xbf16, #tpu.memory_space<vmem>>) attributes {dimension_semantics = [#tpu.dimension_semantics<parallel>], iteration_bounds = array<i64: 1>, scalar_prefetch = 0 : i64, scratch_operands = 0 : i64, tpu.core_type = #tpu.core_type<tc>, window_params = [{transform_indices = @transform_0, window_bounds = array<i64: 16, 32>}, {transform_indices = @transform_1, window_bounds = array<i64: 16, 32>}, {pipeline_mode = #tpu.pipeline_mode<synchronous>, transform_indices = @transform_2, window_bounds = array<i64: 1, 32>}, {pipeline_mode = #tpu.pipeline_mode<synchronous>, transform_indices = @transform_3, window_bounds = array<i64: 1, 32>}, {transform_indices = @transform_4, window_bounds = array<i64: 16, 32>}]} {
    %c0 = arith.constant 0 : index
    %c0_0 = arith.constant 0 : index
    %0 = vector.load %arg1[%c0, %c0_0] : memref<16x32xbf16, #tpu.memory_space<vmem>>, vector<16x32xbf16>
    %1 = arith.extf %0 : vector<16x32xbf16> to vector<16x32xf32>
    %c0_1 = arith.constant 0 : index
    %c0_2 = arith.constant 0 : index
    %2 = vector.load %arg2[%c0_1, %c0_2] : memref<16x32xbf16, #tpu.memory_space<vmem>>, vector<16x32xbf16>
    %3 = arith.extf %2 : vector<16x32xbf16> to vector<16x32xf32>
    %4 = arith.addf %1, %3 : vector<16x32xf32>
    %c0_3 = arith.constant 0 : index
    %c0_4 = arith.constant 0 : index
    %5 = vector.load %arg3[%c0_3, %c0_4] : memref<1x32xf32, #tpu.memory_space<vmem>>, vector<1x32xf32>
    %c0_5 = arith.constant 0 : index
    %c0_6 = arith.constant 0 : index
    %6 = vector.load %arg4[%c0_5, %c0_6] : memref<1x32xf32, #tpu.memory_space<vmem>>, vector<1x32xf32>
    %cst = arith.constant dense<0.000000e+00> : vector<16xf32>
    %7 = vector.multi_reduction <add>, %4, %cst [1] : vector<16x32xf32> to vector<16xf32>
    %8 = vector.shape_cast %7 : vector<16xf32> to vector<16x1xf32>
    %cst_7 = arith.constant 3.200000e+01 : f32
    %9 = vector.broadcast %cst_7 : f32 to vector<16x1xf32>
    %10 = arith.divf %8, %9 : vector<16x1xf32>
    %11 = vector.broadcast %10 : vector<16x1xf32> to vector<16x32xf32>
    %12 = arith.subf %4, %11 : vector<16x32xf32>
    %13 = arith.mulf %12, %12 : vector<16x32xf32>
    %cst_8 = arith.constant dense<0.000000e+00> : vector<16xf32>
    %14 = vector.multi_reduction <add>, %13, %cst_8 [1] : vector<16x32xf32> to vector<16xf32>
    %15 = vector.shape_cast %14 : vector<16xf32> to vector<16x1xf32>
    %cst_9 = arith.constant 3.200000e+01 : f32
    %16 = vector.broadcast %cst_9 : f32 to vector<16x1xf32>
    %17 = arith.divf %15, %16 : vector<16x1xf32>
    %cst_10 = arith.constant 9.99999996E-13 : f32
    %18 = vector.broadcast %cst_10 : f32 to vector<16x1xf32>
    %19 = arith.addf %17, %18 : vector<16x1xf32>
    %20 = math.rsqrt %19 : vector<16x1xf32>
    %21 = vector.broadcast %20 : vector<16x1xf32> to vector<16x32xf32>
    %22 = arith.mulf %12, %21 : vector<16x32xf32>
    %23 = vector.broadcast %5 : vector<1x32xf32> to vector<16x32xf32>
    %24 = arith.mulf %22, %23 : vector<16x32xf32>
    %25 = vector.broadcast %6 : vector<1x32xf32> to vector<16x32xf32>
    %26 = arith.addf %24, %25 : vector<16x32xf32>
    %27 = arith.truncf %26 : vector<16x32xf32> to vector<16x32xbf16>
    %c0_11 = arith.constant 0 : index
    %c0_12 = arith.constant 0 : index
    %28 = vector.load %arg5[%c0_11, %c0_12] : memref<16x32xbf16, #tpu.memory_space<vmem>>, vector<16x32xbf16>
    tpu.vector_store %arg5[%c0_11, %c0_12], %27 {strides = array<i32>} : memref<16x32xbf16, #tpu.memory_space<vmem>>, vector<16x32xbf16>,
    return
  }
  func.func @transform_0(%arg0: i32) -> (i32, i32) {
    %c0_i32 = arith.constant 0 : i32
    %c0_i32_0 = arith.constant 0 : i32
    return %arg0, %c0_i32 : i32, i32
  }
  func.func @transform_1(%arg0: i32) -> (i32, i32) {
    %c0_i32 = arith.constant 0 : i32
    %c0_i32_0 = arith.constant 0 : i32
    return %arg0, %c0_i32 : i32, i32
  }
  func.func @transform_2(%arg0: i32) -> (i32, i32) {
    %c0_i32 = arith.constant 0 : i32
    %c0_i32_0 = arith.constant 0 : i32
    %c0_i32_1 = arith.constant 0 : i32
    return %c0_i32, %c0_i32_0 : i32, i32
  }
  func.func @transform_3(%arg0: i32) -> (i32, i32) {
    %c0_i32 = arith.constant 0 : i32
    %c0_i32_0 = arith.constant 0 : i32
    %c0_i32_1 = arith.constant 0 : i32
    return %c0_i32, %c0_i32_0 : i32, i32
  }
  func.func @transform_4(%arg0: i32) -> (i32, i32) {
    %c0_i32 = arith.constant 0 : i32
    %c0_i32_0 = arith.constant 0 : i32
    return %arg0, %c0_i32 : i32, i32
  }
}

module attributes {stable_mosaic.version = 11 : i64} {
  func.func @_linear_kernel(%arg0: i32, %arg1: i32, %arg2: i32, %arg3: memref<16x32xbf16, #tpu.memory_space<vmem>>, %arg4: memref<32x64xbf16, #tpu.memory_space<vmem>>, %arg5: memref<1x64xf32, #tpu.memory_space<vmem>>, %arg6: memref<16x64xbf16, #tpu.memory_space<vmem>>, %arg7: memref<16x64xf32, #tpu.memory_space<vmem>>) attributes {dimension_semantics = [#tpu.dimension_semantics<parallel>, #tpu.dimension_semantics<parallel>, #tpu.dimension_semantics<arbitrary>], iteration_bounds = array<i64: 1, 1, 1>, scalar_prefetch = 0 : i64, scratch_operands = 1 : i64, tpu.core_type = #tpu.core_type<tc>, window_params = [{transform_indices = @transform_0, window_bounds = array<i64: 16, 32>}, {transform_indices = @transform_1, window_bounds = array<i64: 32, 64>}, {transform_indices = @transform_2, window_bounds = array<i64: 1, 64>}, {transform_indices = @transform_3, window_bounds = array<i64: 16, 64>}]} {
    %c0_i32 = arith.constant 0 : i32
    %0 = arith.cmpi eq, %arg2, %c0_i32 : i32
    %1 = arith.extui %0 : i1 to i32
    %c0_i32_0 = arith.constant 0 : i32
    %2 = arith.cmpi ne, %1, %c0_i32_0 : i32
    scf.if %2 {
      %cst_10 = arith.constant 0.000000e+00 : f32
      %12 = vector.broadcast %cst_10 : f32 to vector<16x64xf32>
      %c0_11 = arith.constant 0 : index
      %c0_12 = arith.constant 0 : index
      %13 = vector.load %arg7[%c0_11, %c0_12] : memref<16x64xf32, #tpu.memory_space<vmem>>, vector<16x64xf32>
      tpu.vector_store %arg7[%c0_11, %c0_12], %12 {strides = array<i32>} : memref<16x64xf32, #tpu.memory_space<vmem>>, vector<16x64xf32>,
    } else {
    }
    %c0 = arith.constant 0 : index
    %c0_1 = arith.constant 0 : index
    %3 = vector.load %arg7[%c0, %c0_1] : memref<16x64xf32, #tpu.memory_space<vmem>>, vector<16x64xf32>
    %c0_2 = arith.constant 0 : index
    %c0_3 = arith.constant 0 : index
    %4 = vector.load %arg3[%c0_2, %c0_3] : memref<16x32xbf16, #tpu.memory_space<vmem>>, vector<16x32xbf16>
    %c0_4 = arith.constant 0 : index
    %c0_5 = arith.constant 0 : index
    %5 = vector.load %arg4[%c0_4, %c0_5] : memref<32x64xbf16, #tpu.memory_space<vmem>>, vector<32x64xbf16>
    %cst = arith.constant dense<0.000000e+00> : vector<16x64xf32>
    %6 = tpu.matmul %4, %5, %cst {dimension_numbers = #tpu.dot_dimension_numbers<[1], [0], [0], [1], [0, 0, 1, 1], [], []>} : vector<16x32xbf16>, vector<32x64xbf16>, vector<16x64xf32> -> vector<16x64xf32>
    %7 = arith.addf %3, %6 : vector<16x64xf32>
    %c0_6 = arith.constant 0 : index
    %c0_7 = arith.constant 0 : index
    %8 = vector.load %arg7[%c0_6, %c0_7] : memref<16x64xf32, #tpu.memory_space<vmem>>, vector<16x64xf32>
    tpu.vector_store %arg7[%c0_6, %c0_7], %7 {strides = array<i32>} : memref<16x64xf32, #tpu.memory_space<vmem>>, vector<16x64xf32>,
    %c0_i32_8 = arith.constant 0 : i32
    %9 = arith.cmpi eq, %arg2, %c0_i32_8 : i32
    %10 = arith.extui %9 : i1 to i32
    %c0_i32_9 = arith.constant 0 : i32
    %11 = arith.cmpi ne, %10, %c0_i32_9 : i32
    scf.if %11 {
      %c0_10 = arith.constant 0 : index
      %c0_11 = arith.constant 0 : index
      %12 = vector.load %arg7[%c0_10, %c0_11] : memref<16x64xf32, #tpu.memory_space<vmem>>, vector<16x64xf32>
      %c0_12 = arith.constant 0 : index
      %c0_13 = arith.constant 0 : index
      %13 = vector.load %arg5[%c0_12, %c0_13] : memref<1x64xf32, #tpu.memory_space<vmem>>, vector<1x64xf32>
      %14 = vector.broadcast %13 : vector<1x64xf32> to vector<16x64xf32>
      %15 = arith.addf %12, %14 : vector<16x64xf32>
      %16 = arith.mulf %15, %15 : vector<16x64xf32>
      %17 = arith.mulf %15, %16 : vector<16x64xf32>
      %cst_14 = arith.constant 4.471500e-02 : f32
      %18 = vector.broadcast %cst_14 : f32 to vector<16x64xf32>
      %19 = arith.mulf %18, %17 : vector<16x64xf32>
      %20 = arith.addf %15, %19 : vector<16x64xf32>
      %cst_15 = arith.constant 0.797884583 : f32
      %21 = vector.broadcast %cst_15 : f32 to vector<16x64xf32>
      %22 = arith.mulf %21, %20 : vector<16x64xf32>
      %23 = math.tanh %22 : vector<16x64xf32>
      %cst_16 = arith.constant 1.000000e+00 : f32
      %24 = vector.broadcast %cst_16 : f32 to vector<16x64xf32>
      %25 = arith.addf %24, %23 : vector<16x64xf32>
      %cst_17 = arith.constant 5.000000e-01 : f32
      %26 = vector.broadcast %cst_17 : f32 to vector<16x64xf32>
      %27 = arith.mulf %26, %25 : vector<16x64xf32>
      %28 = arith.mulf %15, %27 : vector<16x64xf32>
      %29 = arith.truncf %28 : vector<16x64xf32> to vector<16x64xbf16>
      %c0_18 = arith.constant 0 : index
      %c0_19 = arith.constant 0 : index
      %30 = vector.load %arg6[%c0_18, %c0_19] : memref<16x64xbf16, #tpu.memory_space<vmem>>, vector<16x64xbf16>
      tpu.vector_store %arg6[%c0_18, %c0_19], %29 {strides = array<i32>} : memref<16x64xbf16, #tpu.memory_space<vmem>>, vector<16x64xbf16>,
    } else {
    }
    return
  }
  func.func @transform_0(%arg0: i32, %arg1: i32, %arg2: i32) -> (i32, i32) {
    %c0_i32 = arith.constant 0 : i32
    return %arg0, %arg2 : i32, i32
  }
  func.func @transform_1(%arg0: i32, %arg1: i32, %arg2: i32) -> (i32, i32) {
    %c0_i32 = arith.constant 0 : i32
    return %arg2, %arg1 : i32, i32
  }
  func.func @transform_2(%arg0: i32, %arg1: i32, %arg2: i32) -> (i32, i32) {
    %c0_i32 = arith.constant 0 : i32
    %c0_i32_0 = arith.constant 0 : i32
    return %c0_i32, %arg1 : i32, i32
  }
  func.func @transform_3(%arg0: i32, %arg1: i32, %arg2: i32) -> (i32, i32) {
    %c0_i32 = arith.constant 0 : i32
    return %arg0, %arg1 : i32, i32
  }
}

module attributes {stable_mosaic.version = 11 : i64} {
  func.func @_linear_kernel(%arg0: i32, %arg1: i32, %arg2: i32, %arg3: memref<16x64xbf16, #tpu.memory_space<vmem>>, %arg4: memref<64x32xbf16, #tpu.memory_space<vmem>>, %arg5: memref<1x32xf32, #tpu.memory_space<vmem>>, %arg6: memref<16x32xbf16, #tpu.memory_space<vmem>>, %arg7: memref<16x32xf32, #tpu.memory_space<vmem>>) attributes {dimension_semantics = [#tpu.dimension_semantics<parallel>, #tpu.dimension_semantics<parallel>, #tpu.dimension_semantics<arbitrary>], iteration_bounds = array<i64: 1, 1, 1>, scalar_prefetch = 0 : i64, scratch_operands = 1 : i64, tpu.core_type = #tpu.core_type<tc>, window_params = [{transform_indices = @transform_0, window_bounds = array<i64: 16, 64>}, {transform_indices = @transform_1, window_bounds = array<i64: 64, 32>}, {transform_indices = @transform_2, window_bounds = array<i64: 1, 32>}, {transform_indices = @transform_3, window_bounds = array<i64: 16, 32>}]} {
    %c0_i32 = arith.constant 0 : i32
    %0 = arith.cmpi eq, %arg2, %c0_i32 : i32
    %1 = arith.extui %0 : i1 to i32
    %c0_i32_0 = arith.constant 0 : i32
    %2 = arith.cmpi ne, %1, %c0_i32_0 : i32
    scf.if %2 {
      %cst_10 = arith.constant 0.000000e+00 : f32
      %12 = vector.broadcast %cst_10 : f32 to vector<16x32xf32>
      %c0_11 = arith.constant 0 : index
      %c0_12 = arith.constant 0 : index
      %13 = vector.load %arg7[%c0_11, %c0_12] : memref<16x32xf32, #tpu.memory_space<vmem>>, vector<16x32xf32>
      tpu.vector_store %arg7[%c0_11, %c0_12], %12 {strides = array<i32>} : memref<16x32xf32, #tpu.memory_space<vmem>>, vector<16x32xf32>,
    } else {
    }
    %c0 = arith.constant 0 : index
    %c0_1 = arith.constant 0 : index
    %3 = vector.load %arg7[%c0, %c0_1] : memref<16x32xf32, #tpu.memory_space<vmem>>, vector<16x32xf32>
    %c0_2 = arith.constant 0 : index
    %c0_3 = arith.constant 0 : index
    %4 = vector.load %arg3[%c0_2, %c0_3] : memref<16x64xbf16, #tpu.memory_space<vmem>>, vector<16x64xbf16>
    %c0_4 = arith.constant 0 : index
    %c0_5 = arith.constant 0 : index
    %5 = vector.load %arg4[%c0_4, %c0_5] : memref<64x32xbf16, #tpu.memory_space<vmem>>, vector<64x32xbf16>
    %cst = arith.constant dense<0.000000e+00> : vector<16x32xf32>
    %6 = tpu.matmul %4, %5, %cst {dimension_numbers = #tpu.dot_dimension_numbers<[1], [0], [0], [1], [0, 0, 1, 1], [], []>} : vector<16x64xbf16>, vector<64x32xbf16>, vector<16x32xf32> -> vector<16x32xf32>
    %7 = arith.addf %3, %6 : vector<16x32xf32>
    %c0_6 = arith.constant 0 : index
    %c0_7 = arith.constant 0 : index
    %8 = vector.load %arg7[%c0_6, %c0_7] : memref<16x32xf32, #tpu.memory_space<vmem>>, vector<16x32xf32>
    tpu.vector_store %arg7[%c0_6, %c0_7], %7 {strides = array<i32>} : memref<16x32xf32, #tpu.memory_space<vmem>>, vector<16x32xf32>,
    %c0_i32_8 = arith.constant 0 : i32
    %9 = arith.cmpi eq, %arg2, %c0_i32_8 : i32
    %10 = arith.extui %9 : i1 to i32
    %c0_i32_9 = arith.constant 0 : i32
    %11 = arith.cmpi ne, %10, %c0_i32_9 : i32
    scf.if %11 {
      %c0_10 = arith.constant 0 : index
      %c0_11 = arith.constant 0 : index
      %12 = vector.load %arg7[%c0_10, %c0_11] : memref<16x32xf32, #tpu.memory_space<vmem>>, vector<16x32xf32>
      %c0_12 = arith.constant 0 : index
      %c0_13 = arith.constant 0 : index
      %13 = vector.load %arg5[%c0_12, %c0_13] : memref<1x32xf32, #tpu.memory_space<vmem>>, vector<1x32xf32>
      %14 = vector.broadcast %13 : vector<1x32xf32> to vector<16x32xf32>
      %15 = arith.addf %12, %14 : vector<16x32xf32>
      %16 = arith.truncf %15 : vector<16x32xf32> to vector<16x32xbf16>
      %c0_14 = arith.constant 0 : index
      %c0_15 = arith.constant 0 : index
      %17 = vector.load %arg6[%c0_14, %c0_15] : memref<16x32xbf16, #tpu.memory_space<vmem>>, vector<16x32xbf16>
      tpu.vector_store %arg6[%c0_14, %c0_15], %16 {strides = array<i32>} : memref<16x32xbf16, #tpu.memory_space<vmem>>, vector<16x32xbf16>,
    } else {
    }
    return
  }
  func.func @transform_0(%arg0: i32, %arg1: i32, %arg2: i32) -> (i32, i32) {
    %c0_i32 = arith.constant 0 : i32
    return %arg0, %arg2 : i32, i32
  }
  func.func @transform_1(%arg0: i32, %arg1: i32, %arg2: i32) -> (i32, i32) {
    %c0_i32 = arith.constant 0 : i32
    return %arg2, %arg1 : i32, i32
  }
  func.func @transform_2(%arg0: i32, %arg1: i32, %arg2: i32) -> (i32, i32) {
    %c0_i32 = arith.constant 0 : i32
    %c0_i32_0 = arith.constant 0 : i32
    return %c0_i32, %arg1 : i32, i32
  }
  func.func @transform_3(%arg0: i32, %arg1: i32, %arg2: i32) -> (i32, i32) {
    %c0_i32 = arith.constant 0 : i32
    return %arg0, %arg1 : i32, i32
  }
}

</mosaic_0001>

<bundles_post_ra>
// kernel: bert_forward.16
= control target key start
LH: loop header
LB: loop body
LE: loop exit
PB: predicated region body
PF: predicated region fallthrough
CT: control target
= control target key end

     0   :  { %vm19_vm0 = vcmask 785408   ;;  %v151_v0 = vmov 0.0   ;;  %vm152_vm1 = vmmov 0   ;;  %vm47_vm2 = vcmask 261120   ;;  %s195_s1 = inlined_call_operand.vmem [shape: bf16[32,96], index: 1, kind: input, shape index: {}]   ;;  %s196_s0 = inlined_call_operand.vmem [shape: bf16[16,32], index: 0, kind: input, shape index: {}]   ;;  %s197_s2 = inlined_call_operand.vmem [shape: f32[1,96], index: 2, kind: input, shape index: {}]   ;;  %s198_s3 = inlined_call_operand.vmem [shape: bf16[16,96], index: 3, kind: output, shape index: {}]  }
   0x1   :  { %138 = vmatprep.subr.bf16.mxu0 %v151_v0  ;;  %v148_v1 = vld [vmem:[%s195_s1 + $0x8] sm:$0xff]   ;;  %142 = vmatprep.mubr.msk.bf16.mxu0 %vm152_vm1, %v151_v0  ;;  %20 = vst.msk [vmem:[#allocation2] sm:$0xff] %vm19_vm0, %v151_v0  ;;  %21 = vst.msk [vmem:[#allocation2 + $0x8] sm:$0xff] %vm19_vm0, %v151_v0  ;;  %v149_v2 = vld [vmem:[%s195_s1] sm:$0xff]   ;;  %vm119_vm3 = vcmask 781312  }
   0x2   :  { %139 = vmatpush3.bf16.msra.mxu0 %v148_v1  ;;  %v150_v3 = vld [vmem:[%s196_s0] sm:$0xff]  }
   0x3   :  { %140 = vmatprep.subr.bf16.mxu0 %v151_v0  ;;  %v130_v12 = vld [vmem:[%s197_s2] ss:$0 sm:$0xff] }
   0x6   :  { %141 = vmatpush3.bf16.msra.mxu0 %v149_v2 }
   0x8   :  { %v22_v4 = vld [vmem:[#allocation2] sm:$0xff]  ;;  %v23_v8 = vld [vmem:[#allocation2 + $0x8] sm:$0xff] }
   0x9   :  { %143 = vmatmul.mubr.msk.bf16.vlgmr.msra.gmra.mxu0 %vm47_vm2, %v150_v3 }
  0xc9   :  { %v85_v5 = vpop.f32.mrf.mxu0 }
  0xca   :  { %v92_v6 = vadd.f32 %v85_v5, %v22_v4 }
  0xcb   :  { %v144_v7 = vpop.f32.mrf.mxu0 }
  0xcc   :  { %95 = vst.msk [vmem:[#allocation2] sm:$0xff] %vm19_vm0, %v92_v6 }
  0xcd   :  { %v88_v9 = vpop.f32.mrf.mxu0 }
  0xce   :  { %v93_v10 = vadd.f32 %v88_v9, %v23_v8 }
  0xcf   :  { %v145_v11 = vpop.f32.mrf.mxu0 }
  0xd0   :  { %96 = vst.msk [vmem:[#allocation2 + $0x8] sm:$0xff] %vm19_vm0, %v93_v10 }
  0xd3   :  { %v100_v13 = vld [vmem:[#allocation2] sm:$0xff] }
  0xd4   :  { %v109_v14 = vadd.f32 %v130_v12, %v100_v13 }
  0xd6   :  { %v133_v15 = vpack.c.bf16 %v109_v14, %v109_v14 }
  0xd7   :  { %v101_v16 = vld [vmem:[#allocation2 + $0x8] sm:$0xff] }
  0xd8   :  { %120 = vst.msk [vmem:[%s198_s3] sm:$0xf] %vm119_vm3, %v133_v15  ;;  %v110_v17 = vadd.f32 %v130_v12, %v101_v16 }
  0xda   :  { %v134_v18 = vpack.c.bf16 %v110_v17, %v110_v17 }
  0xdc   :  { %121 = vst.msk [vmem:[%s198_s3 + $0x4] sm:$0xf] %vm119_vm3, %v134_v18 }

// kernel: bert_forward.18
= control target key start
LH: loop header
LB: loop body
LE: loop exit
PB: predicated region body
PF: predicated region fallthrough
CT: control target
= control target key end

     0   :  { %vm19_vm0 = vcmask 261120   ;;  %v150_v0 = vmov 0.0   ;;  %vm151_vm1 = vmmov 0   ;;  %vm118_vm2 = vcmask 257024   ;;  %s195_s1 = inlined_call_operand.vmem [shape: bf16[32,32], index: 1, kind: input, shape index: {}]   ;;  %s196_s0 = inlined_call_operand.vmem [shape: bf16[16,32], index: 0, kind: input, shape index: {}]   ;;  %s197_s2 = inlined_call_operand.vmem [shape: f32[1,32], index: 2, kind: input, shape index: {}]   ;;  %s198_s3 = inlined_call_operand.vmem [shape: bf16[16,32], index: 3, kind: output, shape index: {}]  }
   0x1   :  { %137 = vmatprep.subr.bf16.mxu0 %v150_v0  ;;  %v147_v1 = vld [vmem:[%s195_s1 + $0x8] sm:$0xff]   ;;  %141 = vmatprep.mubr.msk.bf16.mxu0 %vm151_vm1, %v150_v0  ;;  %20 = vst.msk [vmem:[#allocation2] sm:$0xff] %vm19_vm0, %v150_v0  ;;  %21 = vst.msk [vmem:[#allocation2 + $0x8] sm:$0xff] %vm19_vm0, %v150_v0  ;;  %v148_v2 = vld [vmem:[%s195_s1] sm:$0xff]  }
   0x2   :  { %138 = vmatpush3.bf16.msra.mxu0 %v147_v1  ;;  %v149_v3 = vld [vmem:[%s196_s0] sm:$0xff]  }
   0x3   :  { %139 = vmatprep.subr.bf16.mxu0 %v150_v0  ;;  %v129_v12 = vld [vmem:[%s197_s2] ss:$0 sm:$0xff] }
   0x6   :  { %140 = vmatpush3.bf16.msra.mxu0 %v148_v2 }
   0x8   :  { %v22_v4 = vld [vmem:[#allocation2] sm:$0xff]  ;;  %v23_v8 = vld [vmem:[#allocation2 + $0x8] sm:$0xff] }
   0x9   :  { %142 = vmatmul.mubr.msk.bf16.vlgmr.msra.gmra.mxu0 %vm19_vm0, %v149_v3 }
  0xc9   :  { %v85_v5 = vpop.f32.mrf.mxu0 }
  0xca   :  { %v92_v6 = vadd.f32 %v85_v5, %v22_v4 }
  0xcb   :  { %v143_v7 = vpop.f32.mrf.mxu0 }
  0xcc   :  { %94 = vst.msk [vmem:[#allocation2] sm:$0xff] %vm19_vm0, %v92_v6 }
  0xcd   :  { %v88_v9 = vpop.f32.mrf.mxu0 }
  0xce   :  { %v93_v10 = vadd.f32 %v88_v9, %v23_v8 }
  0xcf   :  { %v144_v11 = vpop.f32.mrf.mxu0 }
  0xd0   :  { %95 = vst.msk [vmem:[#allocation2 + $0x8] sm:$0xff] %vm19_vm0, %v93_v10 }
  0xd3   :  { %v99_v13 = vld [vmem:[#allocation2] sm:$0xff] }
  0xd4   :  { %v108_v14 = vadd.f32 %v129_v12, %v99_v13 }
  0xd6   :  { %v132_v15 = vpack.c.bf16 %v108_v14, %v108_v14 }
  0xd7   :  { %v100_v16 = vld [vmem:[#allocation2 + $0x8] sm:$0xff] }
  0xd8   :  { %119 = vst.msk [vmem:[%s198_s3] sm:$0xf] %vm118_vm2, %v132_v15  ;;  %v109_v17 = vadd.f32 %v129_v12, %v100_v16 }
  0xda   :  { %v133_v18 = vpack.c.bf16 %v109_v17, %v109_v17 }
  0xdc   :  { %120 = vst.msk [vmem:[%s198_s3 + $0x4] sm:$0xf] %vm118_vm2, %v133_v18 }

// kernel: bert_forward.15
= control target key start
LH: loop header
LB: loop body
LE: loop exit
PB: predicated region body
PF: predicated region fallthrough
CT: control target
= control target key end

     0   :  { %vm20_vm0 = vcmask 261120   ;;  %vm72_vm1 = vcmask 257024   ;;  %s132_s0 = inlined_call_operand.vmem [shape: bf16[16,32], index: 0, kind: input, shape index: {}]   ;;  %s133_s1 = inlined_call_operand.vmem [shape: f32[1,32], index: 1, kind: input, shape index: {}]   ;;  %s134_s2 = inlined_call_operand.vmem [shape: f32[1,32], index: 2, kind: input, shape index: {}]   ;;  %s135_s3 = inlined_call_operand.vmem [shape: bf16[16,32], index: 3, kind: output, shape index: {}]  }
   0x1   :  { %v86_v0 = vld [vmem:[%s132_s0] sm:$0xff]  }
   0x2   :  { %v87_v1 = vunpack.c.l.bf16 %v86_v0  ;;  %v88_v2 = vunpack.c.h.bf16 %v86_v0  ;;  %v79_v22 = vld [vmem:[%s133_s1] ss:$0 sm:$0xff] }
   0x3   :  { %v80_v24 = vld [vmem:[%s134_s2] ss:$0 sm:$0xff] }
   0x4   :  { %v21_v3 = vsel %vm20_vm0, %v87_v1, 0.0  ;;  %v24_v4 = vsel %vm20_vm0, %v88_v2, 0.0 }
   0x5   :  { %22 = vadd.xlane.f32.xlu0 %v21_v3 }
   0x9   :  { %25 = vadd.xlane.f32.xlu0 %v24_v4 }
  0x8e   :  { %v23_v5 = vpop.xlane.xlu0 %22 }
  0x8f   :  { %v28_v6 = vmul.f32 0.03125, %v23_v5 }
  0x91   :  { %v30_v7 = vsub.f32 %v87_v1, %v28_v6 }
  0x92   :  { %v26_v8 = vpop.xlane.xlu0 %25 }
  0x93   :  { %v29_v9 = vmul.f32 0.03125, %v26_v8  ;;  %v32_v10 = vmul.f32 %v30_v7, %v30_v7 }
  0x95   :  { %v31_v11 = vsub.f32 %v88_v2, %v29_v9  ;;  %v34_v12 = vsel %vm20_vm0, %v32_v10, 0.0 }
  0x96   :  { %35 = vadd.xlane.f32.xlu1 %v34_v12 }
  0x97   :  { %v33_v13 = vmul.f32 %v31_v11, %v31_v11 }
  0x99   :  { %v37_v14 = vsel %vm20_vm0, %v33_v13, 0.0 }
  0x9a   :  { %38 = vadd.xlane.f32.xlu1 %v37_v14 }
 0x11f   :  { %v36_v15 = vpop.xlane.xlu1 %35 }
 0x120   :  { %v40_v16 = vmul.f32 0.03125, %v36_v15 }
 0x122   :  { %v42_v17 = vadd.f32 1e-12, %v40_v16 }
 0x123   :  { %v39_v18 = vpop.xlane.xlu1 %38 }
 0x124   :  { %89 = vrsqrt.f32 %v42_v17  ;;  %v41_v19 = vmul.f32 0.03125, %v39_v18 }
 0x126   :  { %v43_v20 = vadd.f32 1e-12, %v41_v19 }
 0x128   :  { %91 = vrsqrt.f32 %v43_v20 }
 0x131   :  { %v90_v21 = vpop.eup %89 }
 0x132   :  { %v46_v23 = vmul.f32 %v90_v21, %v30_v7 }
 0x134   :  { %v54_v25 = vmul.f32 %v79_v22, %v46_v23 }
 0x135   :  { %v92_v26 = vpop.eup %91 }
 0x136   :  { %v62_v27 = vadd.f32 %v80_v24, %v54_v25  ;;  %v47_v28 = vmul.f32 %v92_v26, %v31_v11 }
 0x138   :  { %v83_v29 = vpack.c.bf16 %v62_v27, %v62_v27  ;;  %v55_v30 = vmul.f32 %v79_v22, %v47_v28 }
 0x13a   :  { %73 = vst.msk [vmem:[%s135_s3] sm:$0xf] %vm72_vm1, %v83_v29  ;;  %v63_v31 = vadd.f32 %v80_v24, %v55_v30 }
 0x13c   :  { %v84_v32 = vpack.c.bf16 %v63_v31, %v63_v31 }
 0x13e   :  { %74 = vst.msk [vmem:[%s135_s3 + $0x4] sm:$0xf] %vm72_vm1, %v84_v32 }

// kernel: bert_forward.17
= control target key start
LH: loop header
LB: loop body
LE: loop exit
PB: predicated region body
PF: predicated region fallthrough
CT: control target
= control target key end

     0   :  { %s571_s9 = smov 0   ;;  %s615_s0 = inlined_call_operand.vmem [shape: bf16[2,8,96], index: 0, kind: input, shape index: {}]   ;;  %s616_s1 = inlined_call_operand.vmem [shape: f32[2,1,8], index: 1, kind: input, shape index: {}]   ;;  %s617_s2 = inlined_call_operand.vmem [shape: bf16[2,8,32], index: 2, kind: output, shape index: {}]  }
   0x1 LB: > { %s465_s10 = sadd.s32 4294967295, %s546_s9   ;;  %p469_p0 = scmp.ge.s32.totalorder %s546_s9, 1  ;;  %s546_s9 = sphi %s571_s9, %s12_s9  }
   0x2   : > { %p119_p1 = scmp.lt.s32.totalorder %s546_s9, 3 }
   0x4   : > { %p120_p2 = pnand %p469_p0, %p119_p1 }
   0x5   : > { %p142_p3 = scmp.lt.s32.totalorder (!%p120_p2), %s465_s10, 1  ;;  %s550_s15 = smov (!%p120_p2), 96  }
   0x6   : > { %123 = sbr.rel (%p120_p2) target bundleno = 1169 (0x491), region = 28  ;;  %s551_s16 = smov (!%p120_p2), 64  }
   0x7   : > { %s552_s17 = smov (!%p120_p2), 80   ;;  %s553_s18 = smov (!%p120_p2), 112  }
   0x8   : > { %s554_s22 = smov (!%p120_p2), 48   ;;  %s555_s26 = smov (!%p120_p2), 16  }
   0xb   : > { %v548_v0 = vmov 0.0   ;;  %vm549_vm0 = vmmov 0   ;;  %s619_s10 = smov (!%p142_p3, %s465_s10), 1  ;;  %vm169_vm1 = vcmask 130048   ;;  %vm216_vm2 = vcmask 64512  }
   0xc   : > { %491 = vmatprep.subr.bf16.mxu0 %v548_v0  ;;  %493 = vmatprep.mubr.msk.bf16.mxu0 %vm549_vm0, %v548_v0  ;;  %s470_s11 = sshll.u32 %s619_s10, 2  ;;  %s148_s21 = scalar_lea.vmem %s616_s1, %s619_s10  ;;  %vm233_vm3 = vcmask 1043456   ;;  %vm279_vm4 = vcmask 125952   ;;  %vm401_vm5 = vcmask 257152  }
   0xd   : > { %497 = vmatprep.subr.bf16.mxu1 %v548_v0  ;;  %499 = vmatprep.mubr.msk.bf16.mxu1 %vm549_vm0, %v548_v0  ;;  %s145_s14 = scalar_lea.vmem %s615_s0, %s470_s11  ;;  %v472_v7 = vld [vmem:[%s148_s21] ss:$0 sm:$0xff]  ;;  %s152_s25 = scalar_lea.vmem %s617_s2, %s470_s11 }
   0xe   : > { %v155_v1 = vld [vmem:[%s145_s14] sm:$0xf] }
   0xf   : > { %v473_v2 = vcombine.low %v155_v1, %v155_v1  ;;  %v157_v5 = vmul.bf16 1048592000, %v155_v1 }
  0x11   : > { %167 = vrot.lane.b32.xlu0 %v473_v2, %s550_s15  ;;  %228 = vrot.lane.b32.xlu1 %v473_v2, %s551_s16  ;;  %v476_v6 = vcombine.low %v157_v5, %v157_v5 }
  0x15   : > { %286 = vrot.lane.b32.xlu1 %v473_v2, %s552_s17 }
  0x19   : > { %284 = vrot.lane.b32.xlu1 %v476_v6, %s553_s18 }
  0x83   : > { %v168_v3 = vpop.permute.xlu0 %167  ;;  %v229_v14 = vpop.permute.xlu1 %228 }
  0x84   : > { %v174_v4 = vsel %vm169_vm1, %v168_v3, 0  ;;  %v235_v15 = vsel %vm233_vm3, %v229_v14, 0 }
  0x85   : > { %492 = vmatpush3.bf16.xpose.msra.mxu0 %v174_v4  ;;  %498 = vmatpush3.bf16.msra.mxu1 %v235_v15 }
  0x86   : > { %509 = vmatprep.subr.bf16.mxu0 %v548_v0  ;;  %503 = vmatprep.subr.bf16.mxu1 %v548_v0 }
  0x87   : > { %v287_v19 = vpop.permute.xlu1 %286 }
  0x88   : > { %v292_v21 = vsel %vm169_vm1, %v287_v19, 0 }
  0x8b   : > { %v285_v23 = vpop.permute.xlu1 %284 }
  0x8c   : > { %494 = vmatmul.mubr.msk.bf16.vlgmr.msra.gmra.mxu0 %vm169_vm1, %v157_v5 }
  0x8d   : > { %511 = vmatprep.mubr.msk.bf16.mxu0 %vm549_vm0, %v548_v0 }
 0x14c   : > { %v210_v8 = vpop.f32.mrf.mxu0 }
 0x14d   : > { %v211_v9 = vadd.f32 %v472_v7, %v210_v8 }
 0x14e   : > { %v495_v10 = vpop.f32.mrf.mxu0 }
 0x14f   : > { %v217_v11 = vsel %vm216_vm2, %v211_v9, -inf }
 0x150   : > { %218 = vmax.xlane.f32.xlu0 %v217_v11  ;;  %v213_v12 = vpop.f32.mrf.mxu0 }
 0x152   : > { %v496_v13 = vpop.f32.mrf.mxu0 }
 0x166   : > { %345 = vrot.lane.b32.xlu0 %v473_v2, %s554_s22 }
 0x1d9   : > { %v219_v16 = vpop.xlane.xlu0 %218 }
 0x1da   : > { %v220_v17 = vsub.f32 %v211_v9, %v219_v16 }
 0x1dc   : > { %v221_v18 = vmul.f32 1.442695, %v220_v17 }
 0x1dd   : > { %v346_v34 = vpop.permute.xlu0 %345 }
 0x1de   : > { %532 = vpow2.f32 %v221_v18  ;;  %v351_v35 = vsel %vm233_vm3, %v346_v34, 0 }
 0x1df   : > { %510 = vmatpush3.bf16.msra.mxu0 %v351_v35 }
 0x1eb   : > { %v533_v20 = vpop.eup %532 }
 0x1ec   : > { %v227_v22 = vpack.c.bf16 %v533_v20, %v533_v20  ;;  %v223_v42 = vsel %vm216_vm2, %v533_v20, 0.0 }
 0x1ee   : > { %500 = vmatmul.mubr.msk.bf16.vlgmr.msra.gmra.mxu1 %vm216_vm2, %v227_v22 }
 0x1ef   : > { %504 = vmatpush3.bf16.xpose.msra.mxu1 %v292_v21  ;;  %505 = vmatprep.mubr.msk.bf16.mxu1 %vm549_vm0, %v548_v0 }
 0x1f6   : > { %506 = vmatmul.mubr.msk.bf16.vlgmr.msra.gmra.mxu1 %vm169_vm1, %v285_v23 }
 0x2ae   : > { %v271_v24 = vpop.f32.mrf.mxu1 }
 0x2b0   : > { %v501_v25 = vpop.f32.mrf.mxu1 }
 0x2b2   : > { %v274_v26 = vpop.f32.mrf.mxu1 }
 0x2b4   : > { %v502_v27 = vpop.f32.mrf.mxu1 }
 0x2b6   : > { %v328_v28 = vpop.f32.mrf.mxu1 }
 0x2b7   : > { %v329_v29 = vadd.f32 %v472_v7, %v328_v28 }
 0x2b8   : > { %v507_v30 = vpop.f32.mrf.mxu1 }
 0x2b9   : > { %v334_v31 = vsel %vm216_vm2, %v329_v29, -inf }
 0x2ba   : > { %335 = vmax.xlane.f32.xlu1 %v334_v31  ;;  %v331_v32 = vpop.f32.mrf.mxu1 }
 0x2bc   : > { %v508_v33 = vpop.f32.mrf.mxu1 }
 0x343   : > { %v336_v36 = vpop.xlane.xlu1 %335 }
 0x344   : > { %v337_v37 = vsub.f32 %v329_v29, %v336_v36 }
 0x346   : > { %v338_v38 = vmul.f32 1.442695, %v337_v37 }
 0x348   : > { %534 = vpow2.f32 %v338_v38 }
 0x355   : > { %v535_v39 = vpop.eup %534 }
 0x356   : > { %v340_v40 = vsel %vm216_vm2, %v535_v39, 0.0  ;;  %v344_v41 = vpack.c.bf16 %v535_v39, %v535_v39 }
 0x357   : > { %341 = vadd.xlane.f32.xlu1 %v340_v40 }
 0x358   : > { %512 = vmatmul.mubr.msk.bf16.vlgmr.msra.gmra.mxu0 %vm216_vm2, %v344_v41 }
 0x35b   : > { %224 = vadd.xlane.f32.xlu1 %v223_v42 }
 0x3e0   : > { %v342_v43 = vpop.xlane.xlu1 %341 }
 0x3e4   : > { %v225_v44 = vpop.xlane.xlu1 %224 }
 0x3e5   : > { %536 = vrcp.f32 %v225_v44 }
 0x3e6   : > { %538 = vrcp.f32 %v342_v43 }
 0x3f2   : > { %v537_v45 = vpop.eup %536 }
 0x3f3   : > { %v277_v46 = vmul.f32 %v537_v45, %v271_v24  ;;  %v539_v48 = vpop.eup %538 }
 0x3f5   : > { %v278_v47 = vpack.c.bf16 %v277_v46, %v277_v46 }
 0x3f7   : > { %280 = vst.msk [vmem:[%s152_s25] sm:$0xf] %vm279_vm4, %v278_v47 }
 0x418   : > { %v387_v49 = vpop.f32.mrf.mxu0 }
 0x419   : > { %v393_v50 = vmul.f32 %v539_v48, %v387_v49 }
 0x41a   : > { %v513_v51 = vpop.f32.mrf.mxu0 }
 0x41b   : > { %v482_v52 = vpack.c.bf16 %v393_v50, %v393_v50 }
 0x41c   : > { %v390_v53 = vpop.f32.mrf.mxu0 }
 0x41d   : > { %398 = vrot.lane.b32.xlu1 %v482_v52, %s555_s26 }
 0x41e   : > { %v514_v54 = vpop.f32.mrf.mxu0 }
 0x48f   : > { %v399_v55 = vpop.permute.xlu1 %398 }
 0x490   : > { %402 = vst.msk [vmem:[%s152_s25] sm:$0xf] %vm401_vm5, %v399_v55 }
 0x491 PF: > { %s12_s9 = sadd.s32 1, %s546_s9  }
 0x492   : > { %p9_p4 = scmp.ge.s32.totalorder %s12_s9, 4  }
 0x494   :  { %11 = sbr.rel (!%p9_p4) target bundleno = 1 (0x1), region = 61 }

// kernel: bert_forward.19
= control target key start
LH: loop header
LB: loop body
LE: loop exit
PB: predicated region body
PF: predicated region fallthrough
CT: control target
= control target key end

     0   :  { %vm29_vm0 = vcmask 261120   ;;  %vm81_vm1 = vcmask 257024   ;;  %s153_s0 = inlined_call_operand.vmem [shape: bf16[16,32], index: 0, kind: input, shape index: {}]   ;;  %s154_s1 = inlined_call_operand.vmem [shape: bf16[16,32], index: 1, kind: input, shape index: {}]   ;;  %s155_s2 = inlined_call_operand.vmem [shape: f32[1,32], index: 2, kind: input, shape index: {}]   ;;  %s156_s3 = inlined_call_operand.vmem [shape: f32[1,32], index: 3, kind: input, shape index: {}]   ;;  %s157_s4 = inlined_call_operand.vmem [shape: bf16[16,32], index: 4, kind: output, shape index: {}]  }
   0x1   :  { %v95_v0 = vld [vmem:[%s153_s0] sm:$0xff]  }
   0x2   :  { %v99_v1 = vld [vmem:[%s154_s1] sm:$0xff]   ;;  %v96_v2 = vunpack.c.l.bf16 %v95_v0  ;;  %v97_v4 = vunpack.c.h.bf16 %v95_v0 }
   0x3   :  { %v100_v3 = vunpack.c.l.bf16 %v99_v1  ;;  %v101_v5 = vunpack.c.h.bf16 %v99_v1  ;;  %v88_v27 = vld [vmem:[%s155_s2] ss:$0 sm:$0xff] }
   0x4   :  { %v89_v29 = vld [vmem:[%s156_s3] ss:$0 sm:$0xff] }
   0x5   :  { %v25_v6 = vadd.f32 %v100_v3, %v96_v2  ;;  %v26_v7 = vadd.f32 %v101_v5, %v97_v4 }
   0x7   :  { %v30_v8 = vsel %vm29_vm0, %v25_v6, 0.0  ;;  %v33_v9 = vsel %vm29_vm0, %v26_v7, 0.0 }
   0x8   :  { %31 = vadd.xlane.f32.xlu0 %v30_v8 }
   0xc   :  { %34 = vadd.xlane.f32.xlu0 %v33_v9 }
  0x91   :  { %v32_v10 = vpop.xlane.xlu0 %31 }
  0x92   :  { %v37_v11 = vmul.f32 0.03125, %v32_v10 }
  0x94   :  { %v39_v12 = vsub.f32 %v25_v6, %v37_v11 }
  0x95   :  { %v35_v13 = vpop.xlane.xlu0 %34 }
  0x96   :  { %v38_v14 = vmul.f32 0.03125, %v35_v13  ;;  %v41_v15 = vmul.f32 %v39_v12, %v39_v12 }
  0x98   :  { %v40_v16 = vsub.f32 %v26_v7, %v38_v14  ;;  %v43_v17 = vsel %vm29_vm0, %v41_v15, 0.0 }
  0x99   :  { %44 = vadd.xlane.f32.xlu1 %v43_v17 }
  0x9a   :  { %v42_v18 = vmul.f32 %v40_v16, %v40_v16 }
  0x9c   :  { %v46_v19 = vsel %vm29_vm0, %v42_v18, 0.0 }
  0x9d   :  { %47 = vadd.xlane.f32.xlu1 %v46_v19 }
 0x122   :  { %v45_v20 = vpop.xlane.xlu1 %44 }
 0x123   :  { %v49_v21 = vmul.f32 0.03125, %v45_v20 }
 0x125   :  { %v51_v22 = vadd.f32 1e-12, %v49_v21 }
 0x126   :  { %v48_v23 = vpop.xlane.xlu1 %47 }
 0x127   :  { %102 = vrsqrt.f32 %v51_v22  ;;  %v50_v24 = vmul.f32 0.03125, %v48_v23 }
 0x129   :  { %v52_v25 = vadd.f32 1e-12, %v50_v24 }
 0x12b   :  { %104 = vrsqrt.f32 %v52_v25 }
 0x134   :  { %v103_v26 = vpop.eup %102 }
 0x135   :  { %v55_v28 = vmul.f32 %v103_v26, %v39_v12 }
 0x137   :  { %v63_v30 = vmul.f32 %v88_v27, %v55_v28 }
 0x138   :  { %v105_v31 = vpop.eup %104 }
 0x139   :  { %v71_v32 = vadd.f32 %v89_v29, %v63_v30  ;;  %v56_v33 = vmul.f32 %v105_v31, %v40_v16 }
 0x13b   :  { %v92_v34 = vpack.c.bf16 %v71_v32, %v71_v32  ;;  %v64_v35 = vmul.f32 %v88_v27, %v56_v33 }
 0x13d   :  { %82 = vst.msk [vmem:[%s157_s4] sm:$0xf] %vm81_vm1, %v92_v34  ;;  %v72_v36 = vadd.f32 %v89_v29, %v64_v35 }
 0x13f   :  { %v93_v37 = vpack.c.bf16 %v72_v36, %v72_v36 }
 0x141   :  { %83 = vst.msk [vmem:[%s157_s4 + $0x4] sm:$0xf] %vm81_vm1, %v93_v37 }

// kernel: bert_forward.20
= control target key start
LH: loop header
LB: loop body
LE: loop exit
PB: predicated region body
PF: predicated region fallthrough
CT: control target
= control target key end

     0   :  { %vm19_vm0 = vcmask 523264   ;;  %v173_v0 = vmov 0.0   ;;  %vm174_vm1 = vmmov 0   ;;  %vm47_vm2 = vcmask 261120   ;;  %s217_s1 = inlined_call_operand.vmem [shape: bf16[32,64], index: 1, kind: input, shape index: {}]   ;;  %s218_s0 = inlined_call_operand.vmem [shape: bf16[16,32], index: 0, kind: input, shape index: {}]   ;;  %s219_s2 = inlined_call_operand.vmem [shape: f32[1,64], index: 2, kind: input, shape index: {}]   ;;  %s220_s3 = inlined_call_operand.vmem [shape: bf16[16,64], index: 3, kind: output, shape index: {}]  }
   0x1   :  { %156 = vmatprep.subr.bf16.mxu0 %v173_v0  ;;  %v166_v1 = vld [vmem:[%s217_s1 + $0x8] sm:$0xff]   ;;  %160 = vmatprep.mubr.msk.bf16.mxu0 %vm174_vm1, %v173_v0  ;;  %20 = vst.msk [vmem:[#allocation2] sm:$0xff] %vm19_vm0, %v173_v0  ;;  %21 = vst.msk [vmem:[#allocation2 + $0x8] sm:$0xff] %vm19_vm0, %v173_v0  ;;  %v167_v2 = vld [vmem:[%s217_s1] sm:$0xff]   ;;  %vm137_vm3 = vcmask 519168  }
   0x2   :  { %157 = vmatpush3.bf16.msra.mxu0 %v166_v1  ;;  %v168_v3 = vld [vmem:[%s218_s0] sm:$0xff]  }
   0x3   :  { %158 = vmatprep.subr.bf16.mxu0 %v173_v0  ;;  %v148_v12 = vld [vmem:[%s219_s2] ss:$0 sm:$0xff] }
   0x6   :  { %159 = vmatpush3.bf16.msra.mxu0 %v167_v2 }
   0x8   :  { %v22_v4 = vld [vmem:[#allocation2] sm:$0xff]  ;;  %v23_v8 = vld [vmem:[#allocation2 + $0x8] sm:$0xff] }
   0x9   :  { %161 = vmatmul.mubr.msk.bf16.vlgmr.msra.gmra.mxu0 %vm47_vm2, %v168_v3 }
  0xc9   :  { %v85_v5 = vpop.f32.mrf.mxu0 }
  0xca   :  { %v92_v6 = vadd.f32 %v85_v5, %v22_v4 }
  0xcb   :  { %v162_v7 = vpop.f32.mrf.mxu0 }
  0xcc   :  { %95 = vst.msk [vmem:[#allocation2] sm:$0xff] %vm19_vm0, %v92_v6 }
  0xcd   :  { %v88_v9 = vpop.f32.mrf.mxu0 }
  0xce   :  { %v93_v10 = vadd.f32 %v88_v9, %v23_v8 }
  0xcf   :  { %v163_v11 = vpop.f32.mrf.mxu0 }
  0xd0   :  { %96 = vst.msk [vmem:[#allocation2 + $0x8] sm:$0xff] %vm19_vm0, %v93_v10 }
  0xd3   :  { %v100_v13 = vld [vmem:[#allocation2] sm:$0xff] }
  0xd4   :  { %v109_v14 = vadd.f32 %v148_v12, %v100_v13 }
  0xd6   :  { %v111_v15 = vmul.f32 %v109_v14, %v109_v14 }
  0xd7   :  { %v101_v16 = vld [vmem:[#allocation2 + $0x8] sm:$0xff] }
  0xd8   :  { %v113_v17 = vmul.f32 %v111_v15, %v109_v14  ;;  %v110_v18 = vadd.f32 %v148_v12, %v101_v16 }
  0xda   :  { %v115_v19 = vmul.f32 0.044715, %v113_v17  ;;  %v112_v20 = vmul.f32 %v110_v18, %v110_v18 }
  0xdc   :  { %v117_v21 = vadd.f32 %v115_v19, %v109_v14  ;;  %v114_v22 = vmul.f32 %v112_v20, %v110_v18 }
  0xde   :  { %v119_v23 = vmul.f32 0.7978846, %v117_v21  ;;  %v116_v24 = vmul.f32 0.044715, %v114_v22 }
  0xe0   :  { %169 = vtanh.f32 %v119_v23  ;;  %v118_v25 = vadd.f32 %v116_v24, %v110_v18 }
  0xe2   :  { %v120_v26 = vmul.f32 0.7978846, %v118_v25 }
  0xe4   :  { %171 = vtanh.f32 %v120_v26 }
  0xed   :  { %v170_v27 = vpop.eup %169 }
  0xee   :  { %v123_v28 = vadd.f32 1.0, %v170_v27 }
  0xf0   :  { %v125_v29 = vmul.f32 0.5, %v123_v28 }
  0xf1   :  { %v172_v30 = vpop.eup %171 }
  0xf2   :  { %v127_v31 = vmul.f32 %v125_v29, %v109_v14  ;;  %v124_v32 = vadd.f32 1.0, %v172_v30 }
  0xf4   :  { %v151_v33 = vpack.c.bf16 %v127_v31, %v127_v31  ;;  %v126_v34 = vmul.f32 0.5, %v124_v32 }
  0xf6   :  { %138 = vst.msk [vmem:[%s220_s3] sm:$0xf] %vm137_vm3, %v151_v33  ;;  %v128_v35 = vmul.f32 %v126_v34, %v110_v18 }
  0xf8   :  { %v152_v36 = vpack.c.bf16 %v128_v35, %v128_v35 }
  0xfa   :  { %139 = vst.msk [vmem:[%s220_s3 + $0x4] sm:$0xf] %vm137_vm3, %v152_v36 }

// kernel: bert_forward.21
= control target key start
LH: loop header
LB: loop body
LE: loop exit
PB: predicated region body
PF: predicated region fallthrough
CT: control target
= control target key end

     0   :  { %vm19_vm0 = vcmask 261120   ;;  %v177_v0 = vmov 0.0   ;;  %vm178_vm1 = vmmov 0   ;;  %vm63_vm2 = vcmask 523264   ;;  %s227_s1 = inlined_call_operand.vmem [shape: bf16[64,32], index: 1, kind: input, shape index: {}]   ;;  %s228_s0 = inlined_call_operand.vmem [shape: bf16[16,64], index: 0, kind: input, shape index: {}]   ;;  %s229_s2 = inlined_call_operand.vmem [shape: f32[1,32], index: 2, kind: input, shape index: {}]   ;;  %s230_s3 = inlined_call_operand.vmem [shape: bf16[16,32], index: 3, kind: output, shape index: {}]  }
   0x1   :  { %158 = vmatprep.subr.bf16.mxu0 %v177_v0  ;;  %v172_v1 = vld [vmem:[%s227_s1 + $0x18] sm:$0xff]   ;;  %166 = vmatprep.mubr.msk.bf16.mxu0 %vm178_vm1, %v177_v0  ;;  %20 = vst.msk [vmem:[#allocation2] sm:$0xff] %vm19_vm0, %v177_v0  ;;  %21 = vst.msk [vmem:[#allocation2 + $0x8] sm:$0xff] %vm19_vm0, %v177_v0  ;;  %v173_v2 = vld [vmem:[%s227_s1 + $0x10] sm:$0xff]   ;;  %vm135_vm3 = vcmask 257024  }
   0x2   :  { %159 = vmatpush3.bf16.msra.mxu0 %v172_v1  ;;  %v174_v3 = vld [vmem:[%s227_s1 + $0x8] sm:$0xff]   ;;  %v175_v4 = vld [vmem:[%s227_s1] sm:$0xff]  }
   0x3   :  { %160 = vmatprep.subr.bf16.mxu0 %v177_v0  ;;  %v176_v5 = vld [vmem:[%s228_s0] sm:$0xff]  }
   0x4   :  { %v148_v14 = vld [vmem:[%s229_s2] ss:$0 sm:$0xff] }
   0x6   :  { %161 = vmatpush3.bf16.msra.mxu0 %v173_v2 }
   0x7   :  { %162 = vmatprep.subr.bf16.mxu0 %v177_v0 }
   0x8   :  { %v22_v6 = vld [vmem:[#allocation2] sm:$0xff]  ;;  %v23_v10 = vld [vmem:[#allocation2 + $0x8] sm:$0xff] }
   0xa   :  { %163 = vmatpush3.bf16.msra.mxu0 %v174_v3 }
   0xb   :  { %164 = vmatprep.subr.bf16.mxu0 %v177_v0 }
   0xe   :  { %165 = vmatpush3.bf16.msra.mxu0 %v175_v4 }
  0x11   :  { %167 = vmatmul.mubr.msk.bf16.vlgmr.msra.gmra.mxu0 %vm63_vm2, %v176_v5 }
  0xd1   :  { %v101_v7 = vpop.f32.mrf.mxu0 }
  0xd2   :  { %v108_v8 = vadd.f32 %v101_v7, %v22_v6 }
  0xd3   :  { %v168_v9 = vpop.f32.mrf.mxu0 }
  0xd4   :  { %111 = vst.msk [vmem:[#allocation2] sm:$0xff] %vm19_vm0, %v108_v8 }
  0xd5   :  { %v104_v11 = vpop.f32.mrf.mxu0 }
  0xd6   :  { %v109_v12 = vadd.f32 %v104_v11, %v23_v10 }
  0xd7   :  { %v169_v13 = vpop.f32.mrf.mxu0 }
  0xd8   :  { %112 = vst.msk [vmem:[#allocation2 + $0x8] sm:$0xff] %vm19_vm0, %v109_v12 }
  0xdb   :  { %v116_v15 = vld [vmem:[#allocation2] sm:$0xff] }
  0xdc   :  { %v125_v16 = vadd.f32 %v148_v14, %v116_v15 }
  0xde   :  { %v151_v17 = vpack.c.bf16 %v125_v16, %v125_v16 }
  0xdf   :  { %v117_v18 = vld [vmem:[#allocation2 + $0x8] sm:$0xff] }
  0xe0   :  { %136 = vst.msk [vmem:[%s230_s3] sm:$0xf] %vm135_vm3, %v151_v17  ;;  %v126_v19 = vadd.f32 %v148_v14, %v117_v18 }
  0xe2   :  { %v152_v20 = vpack.c.bf16 %v126_v19, %v126_v19 }
  0xe4   :  { %137 = vst.msk [vmem:[%s230_s3 + $0x4] sm:$0xf] %vm135_vm3, %v152_v20 }

</bundles_post_ra>
